<compile_context>
chip_gen: v7x
topology: tpu7x:2x2x1
jax: 0.10.0
libtpu: 0.0.40
codegen_flags: <defaults>
</compile_context>

<pallas_src>
import functools

import jax
import jax.numpy as jnp
from jax.experimental import pallas as pl
from jax.experimental.pallas import tpu as pltpu

EPS = 1e-5      # nn.BatchNorm2d default eps
LANE = 128      # TPU lane width


def _round_up(x, m):
    return -(-x // m) * m


# ------------------------------ Pallas kernel --------------------------------
def _plain_fused_kernel(xph_ref, w1_ref, g1_ref, b1_ref, w2_ref, g2_ref, b2_ref,
                        o_ref, y1pad_ref, *, n, ho, wo, stride):
    cpi = xph_ref.shape[-1]          # lane-padded in-channels  (conv1 K)
    cp = o_ref.shape[-1]             # lane-padded out-channels (conv1 N, conv2 K/N)
    m = n * ho * wo

    def bn_scale_shift(acc, g, b):
        # training-mode batch stats over the M = N*Ho*Wo rows, biased variance,
        # collapsed so the big tile only sees one FMA pass: y*scale + shift.
        mean = jnp.mean(acc, axis=0, keepdims=True)
        var = jnp.mean(jnp.square(acc - mean), axis=0, keepdims=True)
        scale = g * jax.lax.rsqrt(var + EPS)
        shift = b - mean * scale
        return scale, shift

    # ---------------- conv1: 9 accumulated per-tap MXU matmuls ----------------
    acc = jnp.zeros((m, cp), dtype=jnp.float32)
    for ky in range(3):
        for kx in range(3):
            ph = (ky % stride) * stride + (kx % stride)   # stride-phase slab
            oy, ox = ky // stride, kx // stride           # offset inside the phase
            a = xph_ref[ph * n:(ph + 1) * n, oy:oy + ho, ox:ox + wo, :]
            acc += jnp.dot(a.reshape(m, cpi), w1_ref[ky * 3 + kx],
                           preferred_element_type=jnp.float32)

    # ----------------- BN1 as a single FMA pass, then ReLU --------------------
    s1, t1 = bn_scale_shift(acc, g1_ref[...], b1_ref[...])
    y1 = jnp.maximum(acc * s1 + t1, 0.0)

    # -------- stage y1 (spatially zero-padded) in VMEM for the 2nd conv --------
    y1pad_ref[...] = jnp.zeros(y1pad_ref.shape, y1pad_ref.dtype)
    y1pad_ref[:, 1:1 + ho, 1:1 + wo, :] = y1.reshape(n, ho, wo, cp)

    # ---------------- conv2 (stride 1): 9 accumulated matmuls -----------------
    acc2 = jnp.zeros((m, cp), dtype=jnp.float32)
    for ky in range(3):
        for kx in range(3):
            b = y1pad_ref[:, ky:ky + ho, kx:kx + wo, :]
            acc2 += jnp.dot(b.reshape(m, cp), w2_ref[ky * 3 + kx],
                            preferred_element_type=jnp.float32)

    # --------------------- BN2 as a single FMA pass (no ReLU) ------------------
    s2, t2 = bn_scale_shift(acc2, g2_ref[...], b2_ref[...])
    o_ref[...] = acc2 * s2 + t2


# ------------------------------ wrapper (JAX glue) ----------------------------
def _phase_split(x_nhwc, stride, cp_in):
    """Channel-pad to cp_in, spatial pad=1, split into stride^2 phase slabs.

    Returns (stride*stride*N, Hps, Wps, cp_in) and the conv output size (Ho, Wo).
    The phases partition the padded input, so total bytes ~= the (channel-padded)
    input — the 3x3 taps become unit-stride slices of the phase slabs in-kernel.
    """
    n, h, w, c = x_nhwc.shape
    ho = (h - 1) // stride + 1
    wo = (w - 1) // stride + 1
    x = jnp.pad(x_nhwc, ((0, 0), (1, 1), (1, 1), (0, cp_in - c)))
    hp, wp = h + 2, w + 2
    hp2, wp2 = _round_up(hp, stride), _round_up(wp, stride)
    x = jnp.pad(x, ((0, 0), (0, hp2 - hp), (0, wp2 - wp), (0, 0)))
    hps, wps = hp2 // stride, wp2 // stride
    x = x.reshape(n, hps, stride, wps, stride, cp_in)
    x = jnp.transpose(x, (2, 4, 0, 1, 3, 5))        # (sy, sx, N, Hps, Wps, C)
    return x.reshape(stride * stride * n, hps, wps, cp_in), ho, wo


def plain_forward(x_nchw, params, stride):
    """Forward of the Plain block. Input/output are NCHW (PyTorch convention)."""
    w1, g1, b1, w2, g2, b2 = params                  # HWIO weights, (Cout,) BN params
    n, cin, h, w = x_nchw.shape
    cout = w1.shape[-1]
    cpi = _round_up(cin, LANE)                       # conv1 K, lane-aligned
    cp = _round_up(cout, LANE)                       # conv1 N / conv2 K,N; lane-dense out

    x = jnp.transpose(x_nchw, (0, 2, 3, 1))          # NCHW -> NHWC (channels on lanes)
    xph, ho, wo = _phase_split(x, stride, cpi)

    # Per-tap weight matrices, zero-padded to lane-aligned K/N: (9, K, N).
    w1m = jnp.pad(w1, ((0, 0), (0, 0), (0, cpi - cin), (0, cp - cout))).reshape(9, cpi, cp)
    w2m = jnp.pad(w2, ((0, 0), (0, 0), (0, cp - cout), (0, cp - cout))).reshape(9, cp, cp)

    pad_vec = lambda v: jnp.pad(v.reshape(1, -1), ((0, 0), (0, cp - cout)))
    g1p, b1p, g2p, b2p = map(pad_vec, (g1, b1, g2, b2))

    m = n * ho * wo
    kernel = functools.partial(_plain_fused_kernel, n=n, ho=ho, wo=wo, stride=stride)

    cost = pl.CostEstimate(
        flops=2 * m * 9 * (cpi * cp + cp * cp),
        transcendentals=2 * cp,
        bytes_accessed=4 * (xph.size + w1m.size + w2m.size + 4 * cp + m * cp),
    )

    out = pl.pallas_call(
        kernel,
        out_shape=jax.ShapeDtypeStruct((m, cp), jnp.float32),
        in_specs=[pl.BlockSpec(memory_space=pltpu.MemorySpace.VMEM)] * 7,
        out_specs=pl.BlockSpec(memory_space=pltpu.MemorySpace.VMEM),
        scratch_shapes=[pltpu.VMEM((n, ho + 2, wo + 2, cp), jnp.float32)],
        compiler_params=pltpu.CompilerParams(vmem_limit_bytes=32 * 1024 * 1024),
        cost_estimate=cost,
    )(xph, w1m, g1p, b1p, w2m, g2p, b2p)

    out = out[:, :cout].reshape(n, ho, wo, cout)     # drop zero-padded channels
    return jnp.transpose(out, (0, 3, 1, 2))          # NHWC -> NCHW


# ---------------------------- pure-JAX reference ------------------------------
def _bn_ref(y_nhwc, g, b):
    mean = jnp.mean(y_nhwc, axis=(0, 1, 2), keepdims=True)
    var = jnp.mean(jnp.square(y_nhwc - mean), axis=(0, 1, 2), keepdims=True)
    return (y_nhwc - mean) * jax.lax.rsqrt(var + EPS) * g.reshape(1, 1, 1, -1) \
        + b.reshape(1, 1, 1, -1)


def ref_forward(x_nchw, params, stride):
    w1, g1, b1, w2, g2, b2 = params
    x = jnp.transpose(x_nchw, (0, 2, 3, 1))
    dn = ("NHWC", "HWIO", "NHWC")
    y = jax.lax.conv_general_dilated(x, w1, (stride, stride), ((1, 1), (1, 1)),
                                     dimension_numbers=dn)
    y = jnp.maximum(_bn_ref(y, g1, b1), 0.0)
    y = jax.lax.conv_general_dilated(y, w2, (1, 1), ((1, 1), (1, 1)),
                                     dimension_numbers=dn)
    y = _bn_ref(y, g2, b2)
    return jnp.transpose(y, (0, 3, 1, 2))


# ----------------------------------- main -------------------------------------
if __name__ == "__main__":
    N, IN_CH, OUT_CH, H, W = 2, 4, 8, 16, 16
    STRIDE = 2

    key = jax.random.PRNGKey(0)
    kx, k1, k2, kg1, kb1, kg2, kb2 = jax.random.split(key, 7)

    x = jax.random.normal(kx, (N, IN_CH, H, W), dtype=jnp.float32)

    # Conv weights in HWIO layout (3, 3, Cin, Cout); bias=False in the module.
    w1 = jax.random.normal(k1, (3, 3, IN_CH, OUT_CH), dtype=jnp.float32) * 0.1
    w2 = jax.random.normal(k2, (3, 3, OUT_CH, OUT_CH), dtype=jnp.float32) * 0.1
    # BatchNorm affine params (deterministic, nontrivial).
    g1 = 1.0 + 0.1 * jax.random.normal(kg1, (OUT_CH,), dtype=jnp.float32)
    b1 = 0.1 * jax.random.normal(kb1, (OUT_CH,), dtype=jnp.float32)
    g2 = 1.0 + 0.1 * jax.random.normal(kg2, (OUT_CH,), dtype=jnp.float32)
    b2 = 0.1 * jax.random.normal(kb2, (OUT_CH,), dtype=jnp.float32)

    params = (w1, g1, b1, w2, g2, b2)

    out = jax.jit(plain_forward, static_argnums=2)(x, params, STRIDE)
    out = jax.block_until_ready(out)

    ref = jax.block_until_ready(ref_forward(x, params, STRIDE))

    assert out.shape == (N, OUT_CH, H // STRIDE, W // STRIDE), out.shape
    assert jnp.allclose(out, ref, rtol=1e-4, atol=2e-4), \
        float(jnp.max(jnp.abs(out - ref)))

    print("KERNEL_OK")
</pallas_src>

<mosaic_0001>
module attributes {stable_mosaic.version = 11 : i64} {
  func.func @_plain_fused_kernel(%arg0: memref<8x9x9x128xf32, #tpu.memory_space<vmem>>, %arg1: memref<9x128x128xf32, #tpu.memory_space<vmem>>, %arg2: memref<1x128xf32, #tpu.memory_space<vmem>>, %arg3: memref<1x128xf32, #tpu.memory_space<vmem>>, %arg4: memref<9x128x128xf32, #tpu.memory_space<vmem>>, %arg5: memref<1x128xf32, #tpu.memory_space<vmem>>, %arg6: memref<1x128xf32, #tpu.memory_space<vmem>>, %arg7: memref<128x128xf32, #tpu.memory_space<vmem>>, %arg8: memref<2x10x10x128xf32, #tpu.memory_space<vmem>>) attributes {dimension_semantics = [], scalar_prefetch = 0 : i64, scratch_operands = 1 : i64, tpu.core_type = #tpu.core_type<tc>} {
    %cst = arith.constant 0.000000e+00 : f32
    %0 = vector.broadcast %cst : f32 to vector<128x128xf32>
    %c0 = arith.constant 0 : index
    %c0_0 = arith.constant 0 : index
    %c0_1 = arith.constant 0 : index
    %c0_2 = arith.constant 0 : index
    %1 = vector.load %arg0[%c0, %c0_0, %c0_1, %c0_2] : memref<8x9x9x128xf32, #tpu.memory_space<vmem>>, vector<2x8x8x128xf32>
    %2 = vector.shape_cast %1 : vector<2x8x8x128xf32> to vector<128x128xf32>
    %c0_3 = arith.constant 0 : index
    %c0_4 = arith.constant 0 : index
    %c0_5 = arith.constant 0 : index
    %3 = vector.load %arg1[%c0_3, %c0_4, %c0_5] : memref<9x128x128xf32, #tpu.memory_space<vmem>>, vector<1x128x128xf32>
    %4 = vector.shape_cast %3 : vector<1x128x128xf32> to vector<128x128xf32>
    %cst_6 = arith.constant dense<0.000000e+00> : vector<128x128xf32>
    %5 = tpu.matmul %2, %4, %cst_6 {dimension_numbers = #tpu.dot_dimension_numbers<[1], [0], [0], [1], [0, 0, 1, 1], [], []>} : vector<128x128xf32>, vector<128x128xf32>, vector<128x128xf32> -> vector<128x128xf32>
    %6 = arith.addf %0, %5 : vector<128x128xf32>
    %c2 = arith.constant 2 : index
    %c0_7 = arith.constant 0 : index
    %c0_8 = arith.constant 0 : index
    %c0_9 = arith.constant 0 : index
    %7 = vector.load %arg0[%c2, %c0_7, %c0_8, %c0_9] : memref<8x9x9x128xf32, #tpu.memory_space<vmem>>, vector<2x8x8x128xf32>
    %8 = vector.shape_cast %7 : vector<2x8x8x128xf32> to vector<128x128xf32>
    %c1 = arith.constant 1 : index
    %c0_10 = arith.constant 0 : index
    %c0_11 = arith.constant 0 : index
    %9 = vector.load %arg1[%c1, %c0_10, %c0_11] : memref<9x128x128xf32, #tpu.memory_space<vmem>>, vector<1x128x128xf32>
    %10 = vector.shape_cast %9 : vector<1x128x128xf32> to vector<128x128xf32>
    %cst_12 = arith.constant dense<0.000000e+00> : vector<128x128xf32>
    %11 = tpu.matmul %8, %10, %cst_12 {dimension_numbers = #tpu.dot_dimension_numbers<[1], [0], [0], [1], [0, 0, 1, 1], [], []>} : vector<128x128xf32>, vector<128x128xf32>, vector<128x128xf32> -> vector<128x128xf32>
    %12 = arith.addf %6, %11 : vector<128x128xf32>
    %c0_13 = arith.constant 0 : index
    %c0_14 = arith.constant 0 : index
    %c1_15 = arith.constant 1 : index
    %c0_16 = arith.constant 0 : index
    %13 = vector.load %arg0[%c0_13, %c0_14, %c1_15, %c0_16] : memref<8x9x9x128xf32, #tpu.memory_space<vmem>>, vector<2x8x8x128xf32>
    %14 = vector.shape_cast %13 : vector<2x8x8x128xf32> to vector<128x128xf32>
    %c2_17 = arith.constant 2 : index
    %c0_18 = arith.constant 0 : index
    %c0_19 = arith.constant 0 : index
    %15 = vector.load %arg1[%c2_17, %c0_18, %c0_19] : memref<9x128x128xf32, #tpu.memory_space<vmem>>, vector<1x128x128xf32>
    %16 = vector.shape_cast %15 : vector<1x128x128xf32> to vector<128x128xf32>
    %cst_20 = arith.constant dense<0.000000e+00> : vector<128x128xf32>
    %17 = tpu.matmul %14, %16, %cst_20 {dimension_numbers = #tpu.dot_dimension_numbers<[1], [0], [0], [1], [0, 0, 1, 1], [], []>} : vector<128x128xf32>, vector<128x128xf32>, vector<128x128xf32> -> vector<128x128xf32>
    %18 = arith.addf %12, %17 : vector<128x128xf32>
    %c4 = arith.constant 4 : index
    %c0_21 = arith.constant 0 : index
    %c0_22 = arith.constant 0 : index
    %c0_23 = arith.constant 0 : index
    %19 = vector.load %arg0[%c4, %c0_21, %c0_22, %c0_23] : memref<8x9x9x128xf32, #tpu.memory_space<vmem>>, vector<2x8x8x128xf32>
    %20 = vector.shape_cast %19 : vector<2x8x8x128xf32> to vector<128x128xf32>
    %c3 = arith.constant 3 : index
    %c0_24 = arith.constant 0 : index
    %c0_25 = arith.constant 0 : index
    %21 = vector.load %arg1[%c3, %c0_24, %c0_25] : memref<9x128x128xf32, #tpu.memory_space<vmem>>, vector<1x128x128xf32>
    %22 = vector.shape_cast %21 : vector<1x128x128xf32> to vector<128x128xf32>
    %cst_26 = arith.constant dense<0.000000e+00> : vector<128x128xf32>
    %23 = tpu.matmul %20, %22, %cst_26 {dimension_numbers = #tpu.dot_dimension_numbers<[1], [0], [0], [1], [0, 0, 1, 1], [], []>} : vector<128x128xf32>, vector<128x128xf32>, vector<128x128xf32> -> vector<128x128xf32>
    %24 = arith.addf %18, %23 : vector<128x128xf32>
    %c6 = arith.constant 6 : index
    %c0_27 = arith.constant 0 : index
    %c0_28 = arith.constant 0 : index
    %c0_29 = arith.constant 0 : index
    %25 = vector.load %arg0[%c6, %c0_27, %c0_28, %c0_29] : memref<8x9x9x128xf32, #tpu.memory_space<vmem>>, vector<2x8x8x128xf32>
    %26 = vector.shape_cast %25 : vector<2x8x8x128xf32> to vector<128x128xf32>
    %c4_30 = arith.constant 4 : index
    %c0_31 = arith.constant 0 : index
    %c0_32 = arith.constant 0 : index
    %27 = vector.load %arg1[%c4_30, %c0_31, %c0_32] : memref<9x128x128xf32, #tpu.memory_space<vmem>>, vector<1x128x128xf32>
    %28 = vector.shape_cast %27 : vector<1x128x128xf32> to vector<128x128xf32>
    %cst_33 = arith.constant dense<0.000000e+00> : vector<128x128xf32>
    %29 = tpu.matmul %26, %28, %cst_33 {dimension_numbers = #tpu.dot_dimension_numbers<[1], [0], [0], [1], [0, 0, 1, 1], [], []>} : vector<128x128xf32>, vector<128x128xf32>, vector<128x128xf32> -> vector<128x128xf32>
    %30 = arith.addf %24, %29 : vector<128x128xf32>
    %c4_34 = arith.constant 4 : index
    %c0_35 = arith.constant 0 : index
    %c1_36 = arith.constant 1 : index
    %c0_37 = arith.constant 0 : index
    %31 = vector.load %arg0[%c4_34, %c0_35, %c1_36, %c0_37] : memref<8x9x9x128xf32, #tpu.memory_space<vmem>>, vector<2x8x8x128xf32>
    %32 = vector.shape_cast %31 : vector<2x8x8x128xf32> to vector<128x128xf32>
    %c5 = arith.constant 5 : index
    %c0_38 = arith.constant 0 : index
    %c0_39 = arith.constant 0 : index
    %33 = vector.load %arg1[%c5, %c0_38, %c0_39] : memref<9x128x128xf32, #tpu.memory_space<vmem>>, vector<1x128x128xf32>
    %34 = vector.shape_cast %33 : vector<1x128x128xf32> to vector<128x128xf32>
    %cst_40 = arith.constant dense<0.000000e+00> : vector<128x128xf32>
    %35 = tpu.matmul %32, %34, %cst_40 {dimension_numbers = #tpu.dot_dimension_numbers<[1], [0], [0], [1], [0, 0, 1, 1], [], []>} : vector<128x128xf32>, vector<128x128xf32>, vector<128x128xf32> -> vector<128x128xf32>
    %36 = arith.addf %30, %35 : vector<128x128xf32>
    %c0_41 = arith.constant 0 : index
    %c1_42 = arith.constant 1 : index
    %c0_43 = arith.constant 0 : index
    %c0_44 = arith.constant 0 : index
    %37 = vector.load %arg0[%c0_41, %c1_42, %c0_43, %c0_44] : memref<8x9x9x128xf32, #tpu.memory_space<vmem>>, vector<2x8x8x128xf32>
    %38 = vector.shape_cast %37 : vector<2x8x8x128xf32> to vector<128x128xf32>
    %c6_45 = arith.constant 6 : index
    %c0_46 = arith.constant 0 : index
    %c0_47 = arith.constant 0 : index
    %39 = vector.load %arg1[%c6_45, %c0_46, %c0_47] : memref<9x128x128xf32, #tpu.memory_space<vmem>>, vector<1x128x128xf32>
    %40 = vector.shape_cast %39 : vector<1x128x128xf32> to vector<128x128xf32>
    %cst_48 = arith.constant dense<0.000000e+00> : vector<128x128xf32>
    %41 = tpu.matmul %38, %40, %cst_48 {dimension_numbers = #tpu.dot_dimension_numbers<[1], [0], [0], [1], [0, 0, 1, 1], [], []>} : vector<128x128xf32>, vector<128x128xf32>, vector<128x128xf32> -> vector<128x128xf32>
    %42 = arith.addf %36, %41 : vector<128x128xf32>
    %c2_49 = arith.constant 2 : index
    %c1_50 = arith.constant 1 : index
    %c0_51 = arith.constant 0 : index
    %c0_52 = arith.constant 0 : index
    %43 = vector.load %arg0[%c2_49, %c1_50, %c0_51, %c0_52] : memref<8x9x9x128xf32, #tpu.memory_space<vmem>>, vector<2x8x8x128xf32>
    %44 = vector.shape_cast %43 : vector<2x8x8x128xf32> to vector<128x128xf32>
    %c7 = arith.constant 7 : index
    %c0_53 = arith.constant 0 : index
    %c0_54 = arith.constant 0 : index
    %45 = vector.load %arg1[%c7, %c0_53, %c0_54] : memref<9x128x128xf32, #tpu.memory_space<vmem>>, vector<1x128x128xf32>
    %46 = vector.shape_cast %45 : vector<1x128x128xf32> to vector<128x128xf32>
    %cst_55 = arith.constant dense<0.000000e+00> : vector<128x128xf32>
    %47 = tpu.matmul %44, %46, %cst_55 {dimension_numbers = #tpu.dot_dimension_numbers<[1], [0], [0], [1], [0, 0, 1, 1], [], []>} : vector<128x128xf32>, vector<128x128xf32>, vector<128x128xf32> -> vector<128x128xf32>
    %48 = arith.addf %42, %47 : vector<128x128xf32>
    %c0_56 = arith.constant 0 : index
    %c1_57 = arith.constant 1 : index
    %c1_58 = arith.constant 1 : index
    %c0_59 = arith.constant 0 : index
    %49 = vector.load %arg0[%c0_56, %c1_57, %c1_58, %c0_59] : memref<8x9x9x128xf32, #tpu.memory_space<vmem>>, vector<2x8x8x128xf32>
    %50 = vector.shape_cast %49 : vector<2x8x8x128xf32> to vector<128x128xf32>
    %c8 = arith.constant 8 : index
    %c0_60 = arith.constant 0 : index
    %c0_61 = arith.constant 0 : index
    %51 = vector.load %arg1[%c8, %c0_60, %c0_61] : memref<9x128x128xf32, #tpu.memory_space<vmem>>, vector<1x128x128xf32>
    %52 = vector.shape_cast %51 : vector<1x128x128xf32> to vector<128x128xf32>
    %cst_62 = arith.constant dense<0.000000e+00> : vector<128x128xf32>
    %53 = tpu.matmul %50, %52, %cst_62 {dimension_numbers = #tpu.dot_dimension_numbers<[1], [0], [0], [1], [0, 0, 1, 1], [], []>} : vector<128x128xf32>, vector<128x128xf32>, vector<128x128xf32> -> vector<128x128xf32>
    %54 = arith.addf %48, %53 : vector<128x128xf32>
    %c0_63 = arith.constant 0 : index
    %c0_64 = arith.constant 0 : index
    %55 = vector.load %arg2[%c0_63, %c0_64] : memref<1x128xf32, #tpu.memory_space<vmem>>, vector<1x128xf32>
    %c0_65 = arith.constant 0 : index
    %c0_66 = arith.constant 0 : index
    %56 = vector.load %arg3[%c0_65, %c0_66] : memref<1x128xf32, #tpu.memory_space<vmem>>, vector<1x128xf32>
    %cst_67 = arith.constant dense<0.000000e+00> : vector<128xf32>
    %57 = vector.multi_reduction <add>, %54, %cst_67 [0] : vector<128x128xf32> to vector<128xf32>
    %58 = vector.shape_cast %57 : vector<128xf32> to vector<1x128xf32>
    %cst_68 = arith.constant 1.280000e+02 : f32
    %59 = vector.broadcast %cst_68 : f32 to vector<1x128xf32>
    %60 = arith.divf %58, %59 : vector<1x128xf32>
    %61 = vector.broadcast %60 : vector<1x128xf32> to vector<128x128xf32>
    %62 = arith.subf %54, %61 : vector<128x128xf32>
    %63 = arith.mulf %62, %62 : vector<128x128xf32>
    %cst_69 = arith.constant dense<0.000000e+00> : vector<128xf32>
    %64 = vector.multi_reduction <add>, %63, %cst_69 [0] : vector<128x128xf32> to vector<128xf32>
    %65 = vector.shape_cast %64 : vector<128xf32> to vector<1x128xf32>
    %cst_70 = arith.constant 1.280000e+02 : f32
    %66 = vector.broadcast %cst_70 : f32 to vector<1x128xf32>
    %67 = arith.divf %65, %66 : vector<1x128xf32>
    %cst_71 = arith.constant 9.99999974E-6 : f32
    %68 = vector.broadcast %cst_71 : f32 to vector<1x128xf32>
    %69 = arith.addf %67, %68 : vector<1x128xf32>
    %70 = math.rsqrt %69 : vector<1x128xf32>
    %71 = arith.mulf %55, %70 : vector<1x128xf32>
    %72 = arith.mulf %60, %71 : vector<1x128xf32>
    %73 = arith.subf %56, %72 : vector<1x128xf32>
    %74 = vector.broadcast %71 : vector<1x128xf32> to vector<128x128xf32>
    %75 = arith.mulf %54, %74 : vector<128x128xf32>
    %76 = vector.broadcast %73 : vector<1x128xf32> to vector<128x128xf32>
    %77 = arith.addf %75, %76 : vector<128x128xf32>
    %cst_72 = arith.constant 0.000000e+00 : f32
    %78 = vector.broadcast %cst_72 : f32 to vector<128x128xf32>
    %79 = arith.maximumf %77, %78 : vector<128x128xf32>
    %cst_73 = arith.constant 0.000000e+00 : f32
    %80 = vector.broadcast %cst_73 : f32 to vector<2x10x10x128xf32>
    %c0_74 = arith.constant 0 : index
    %c0_75 = arith.constant 0 : index
    %c0_76 = arith.constant 0 : index
    %c0_77 = arith.constant 0 : index
    %81 = vector.load %arg8[%c0_74, %c0_75, %c0_76, %c0_77] : memref<2x10x10x128xf32, #tpu.memory_space<vmem>>, vector<2x10x10x128xf32>
    tpu.vector_store %arg8[%c0_74, %c0_75, %c0_76, %c0_77], %80 {strides = array<i32>} : memref<2x10x10x128xf32, #tpu.memory_space<vmem>>, vector<2x10x10x128xf32>,
    %82 = vector.shape_cast %79 : vector<128x128xf32> to vector<2x8x8x128xf32>
    %c0_78 = arith.constant 0 : index
    %c1_79 = arith.constant 1 : index
    %c1_80 = arith.constant 1 : index
    %c0_81 = arith.constant 0 : index
    %83 = vector.load %arg8[%c0_78, %c1_79, %c1_80, %c0_81] : memref<2x10x10x128xf32, #tpu.memory_space<vmem>>, vector<2x8x8x128xf32>
    tpu.vector_store %arg8[%c0_78, %c1_79, %c1_80, %c0_81], %82 {strides = array<i32>} : memref<2x10x10x128xf32, #tpu.memory_space<vmem>>, vector<2x8x8x128xf32>,
    %cst_82 = arith.constant 0.000000e+00 : f32
    %84 = vector.broadcast %cst_82 : f32 to vector<128x128xf32>
    %c0_83 = arith.constant 0 : index
    %c0_84 = arith.constant 0 : index
    %c0_85 = arith.constant 0 : index
    %c0_86 = arith.constant 0 : index
    %85 = vector.load %arg8[%c0_83, %c0_84, %c0_85, %c0_86] : memref<2x10x10x128xf32, #tpu.memory_space<vmem>>, vector<2x8x8x128xf32>
    %86 = vector.shape_cast %85 : vector<2x8x8x128xf32> to vector<128x128xf32>
    %c0_87 = arith.constant 0 : index
    %c0_88 = arith.constant 0 : index
    %c0_89 = arith.constant 0 : index
    %87 = vector.load %arg4[%c0_87, %c0_88, %c0_89] : memref<9x128x128xf32, #tpu.memory_space<vmem>>, vector<1x128x128xf32>
    %88 = vector.shape_cast %87 : vector<1x128x128xf32> to vector<128x128xf32>
    %cst_90 = arith.constant dense<0.000000e+00> : vector<128x128xf32>
    %89 = tpu.matmul %86, %88, %cst_90 {dimension_numbers = #tpu.dot_dimension_numbers<[1], [0], [0], [1], [0, 0, 1, 1], [], []>} : vector<128x128xf32>, vector<128x128xf32>, vector<128x128xf32> -> vector<128x128xf32>
    %90 = arith.addf %84, %89 : vector<128x128xf32>
    %c0_91 = arith.constant 0 : index
    %c0_92 = arith.constant 0 : index
    %c1_93 = arith.constant 1 : index
    %c0_94 = arith.constant 0 : index
    %91 = vector.load %arg8[%c0_91, %c0_92, %c1_93, %c0_94] : memref<2x10x10x128xf32, #tpu.memory_space<vmem>>, vector<2x8x8x128xf32>
    %92 = vector.shape_cast %91 : vector<2x8x8x128xf32> to vector<128x128xf32>
    %c1_95 = arith.constant 1 : index
    %c0_96 = arith.constant 0 : index
    %c0_97 = arith.constant 0 : index
    %93 = vector.load %arg4[%c1_95, %c0_96, %c0_97] : memref<9x128x128xf32, #tpu.memory_space<vmem>>, vector<1x128x128xf32>
    %94 = vector.shape_cast %93 : vector<1x128x128xf32> to vector<128x128xf32>
    %cst_98 = arith.constant dense<0.000000e+00> : vector<128x128xf32>
    %95 = tpu.matmul %92, %94, %cst_98 {dimension_numbers = #tpu.dot_dimension_numbers<[1], [0], [0], [1], [0, 0, 1, 1], [], []>} : vector<128x128xf32>, vector<128x128xf32>, vector<128x128xf32> -> vector<128x128xf32>
    %96 = arith.addf %90, %95 : vector<128x128xf32>
    %c0_99 = arith.constant 0 : index
    %c0_100 = arith.constant 0 : index
    %c2_101 = arith.constant 2 : index
    %c0_102 = arith.constant 0 : index
    %97 = vector.load %arg8[%c0_99, %c0_100, %c2_101, %c0_102] : memref<2x10x10x128xf32, #tpu.memory_space<vmem>>, vector<2x8x8x128xf32>
    %98 = vector.shape_cast %97 : vector<2x8x8x128xf32> to vector<128x128xf32>
    %c2_103 = arith.constant 2 : index
    %c0_104 = arith.constant 0 : index
    %c0_105 = arith.constant 0 : index
    %99 = vector.load %arg4[%c2_103, %c0_104, %c0_105] : memref<9x128x128xf32, #tpu.memory_space<vmem>>, vector<1x128x128xf32>
    %100 = vector.shape_cast %99 : vector<1x128x128xf32> to vector<128x128xf32>
    %cst_106 = arith.constant dense<0.000000e+00> : vector<128x128xf32>
    %101 = tpu.matmul %98, %100, %cst_106 {dimension_numbers = #tpu.dot_dimension_numbers<[1], [0], [0], [1], [0, 0, 1, 1], [], []>} : vector<128x128xf32>, vector<128x128xf32>, vector<128x128xf32> -> vector<128x128xf32>
    %102 = arith.addf %96, %101 : vector<128x128xf32>
    %c0_107 = arith.constant 0 : index
    %c1_108 = arith.constant 1 : index
    %c0_109 = arith.constant 0 : index
    %c0_110 = arith.constant 0 : index
    %103 = vector.load %arg8[%c0_107, %c1_108, %c0_109, %c0_110] : memref<2x10x10x128xf32, #tpu.memory_space<vmem>>, vector<2x8x8x128xf32>
    %104 = vector.shape_cast %103 : vector<2x8x8x128xf32> to vector<128x128xf32>
    %c3_111 = arith.constant 3 : index
    %c0_112 = arith.constant 0 : index
    %c0_113 = arith.constant 0 : index
    %105 = vector.load %arg4[%c3_111, %c0_112, %c0_113] : memref<9x128x128xf32, #tpu.memory_space<vmem>>, vector<1x128x128xf32>
    %106 = vector.shape_cast %105 : vector<1x128x128xf32> to vector<128x128xf32>
    %cst_114 = arith.constant dense<0.000000e+00> : vector<128x128xf32>
    %107 = tpu.matmul %104, %106, %cst_114 {dimension_numbers = #tpu.dot_dimension_numbers<[1], [0], [0], [1], [0, 0, 1, 1], [], []>} : vector<128x128xf32>, vector<128x128xf32>, vector<128x128xf32> -> vector<128x128xf32>
    %108 = arith.addf %102, %107 : vector<128x128xf32>
    %c0_115 = arith.constant 0 : index
    %c1_116 = arith.constant 1 : index
    %c1_117 = arith.constant 1 : index
    %c0_118 = arith.constant 0 : index
    %109 = vector.load %arg8[%c0_115, %c1_116, %c1_117, %c0_118] : memref<2x10x10x128xf32, #tpu.memory_space<vmem>>, vector<2x8x8x128xf32>
    %110 = vector.shape_cast %109 : vector<2x8x8x128xf32> to vector<128x128xf32>
    %c4_119 = arith.constant 4 : index
    %c0_120 = arith.constant 0 : index
    %c0_121 = arith.constant 0 : index
    %111 = vector.load %arg4[%c4_119, %c0_120, %c0_121] : memref<9x128x128xf32, #tpu.memory_space<vmem>>, vector<1x128x128xf32>
    %112 = vector.shape_cast %111 : vector<1x128x128xf32> to vector<128x128xf32>
    %cst_122 = arith.constant dense<0.000000e+00> : vector<128x128xf32>
    %113 = tpu.matmul %110, %112, %cst_122 {dimension_numbers = #tpu.dot_dimension_numbers<[1], [0], [0], [1], [0, 0, 1, 1], [], []>} : vector<128x128xf32>, vector<128x128xf32>, vector<128x128xf32> -> vector<128x128xf32>
    %114 = arith.addf %108, %113 : vector<128x128xf32>
    %c0_123 = arith.constant 0 : index
    %c1_124 = arith.constant 1 : index
    %c2_125 = arith.constant 2 : index
    %c0_126 = arith.constant 0 : index
    %115 = vector.load %arg8[%c0_123, %c1_124, %c2_125, %c0_126] : memref<2x10x10x128xf32, #tpu.memory_space<vmem>>, vector<2x8x8x128xf32>
    %116 = vector.shape_cast %115 : vector<2x8x8x128xf32> to vector<128x128xf32>
    %c5_127 = arith.constant 5 : index
    %c0_128 = arith.constant 0 : index
    %c0_129 = arith.constant 0 : index
    %117 = vector.load %arg4[%c5_127, %c0_128, %c0_129] : memref<9x128x128xf32, #tpu.memory_space<vmem>>, vector<1x128x128xf32>
    %118 = vector.shape_cast %117 : vector<1x128x128xf32> to vector<128x128xf32>
    %cst_130 = arith.constant dense<0.000000e+00> : vector<128x128xf32>
    %119 = tpu.matmul %116, %118, %cst_130 {dimension_numbers = #tpu.dot_dimension_numbers<[1], [0], [0], [1], [0, 0, 1, 1], [], []>} : vector<128x128xf32>, vector<128x128xf32>, vector<128x128xf32> -> vector<128x128xf32>
    %120 = arith.addf %114, %119 : vector<128x128xf32>
    %c0_131 = arith.constant 0 : index
    %c2_132 = arith.constant 2 : index
    %c0_133 = arith.constant 0 : index
    %c0_134 = arith.constant 0 : index
    %121 = vector.load %arg8[%c0_131, %c2_132, %c0_133, %c0_134] : memref<2x10x10x128xf32, #tpu.memory_space<vmem>>, vector<2x8x8x128xf32>
    %122 = vector.shape_cast %121 : vector<2x8x8x128xf32> to vector<128x128xf32>
    %c6_135 = arith.constant 6 : index
    %c0_136 = arith.constant 0 : index
    %c0_137 = arith.constant 0 : index
    %123 = vector.load %arg4[%c6_135, %c0_136, %c0_137] : memref<9x128x128xf32, #tpu.memory_space<vmem>>, vector<1x128x128xf32>
    %124 = vector.shape_cast %123 : vector<1x128x128xf32> to vector<128x128xf32>
    %cst_138 = arith.constant dense<0.000000e+00> : vector<128x128xf32>
    %125 = tpu.matmul %122, %124, %cst_138 {dimension_numbers = #tpu.dot_dimension_numbers<[1], [0], [0], [1], [0, 0, 1, 1], [], []>} : vector<128x128xf32>, vector<128x128xf32>, vector<128x128xf32> -> vector<128x128xf32>
    %126 = arith.addf %120, %125 : vector<128x128xf32>
    %c0_139 = arith.constant 0 : index
    %c2_140 = arith.constant 2 : index
    %c1_141 = arith.constant 1 : index
    %c0_142 = arith.constant 0 : index
    %127 = vector.load %arg8[%c0_139, %c2_140, %c1_141, %c0_142] : memref<2x10x10x128xf32, #tpu.memory_space<vmem>>, vector<2x8x8x128xf32>
    %128 = vector.shape_cast %127 : vector<2x8x8x128xf32> to vector<128x128xf32>
    %c7_143 = arith.constant 7 : index
    %c0_144 = arith.constant 0 : index
    %c0_145 = arith.constant 0 : index
    %129 = vector.load %arg4[%c7_143, %c0_144, %c0_145] : memref<9x128x128xf32, #tpu.memory_space<vmem>>, vector<1x128x128xf32>
    %130 = vector.shape_cast %129 : vector<1x128x128xf32> to vector<128x128xf32>
    %cst_146 = arith.constant dense<0.000000e+00> : vector<128x128xf32>
    %131 = tpu.matmul %128, %130, %cst_146 {dimension_numbers = #tpu.dot_dimension_numbers<[1], [0], [0], [1], [0, 0, 1, 1], [], []>} : vector<128x128xf32>, vector<128x128xf32>, vector<128x128xf32> -> vector<128x128xf32>
    %132 = arith.addf %126, %131 : vector<128x128xf32>
    %c0_147 = arith.constant 0 : index
    %c2_148 = arith.constant 2 : index
    %c2_149 = arith.constant 2 : index
    %c0_150 = arith.constant 0 : index
    %133 = vector.load %arg8[%c0_147, %c2_148, %c2_149, %c0_150] : memref<2x10x10x128xf32, #tpu.memory_space<vmem>>, vector<2x8x8x128xf32>
    %134 = vector.shape_cast %133 : vector<2x8x8x128xf32> to vector<128x128xf32>
    %c8_151 = arith.constant 8 : index
    %c0_152 = arith.constant 0 : index
    %c0_153 = arith.constant 0 : index
    %135 = vector.load %arg4[%c8_151, %c0_152, %c0_153] : memref<9x128x128xf32, #tpu.memory_space<vmem>>, vector<1x128x128xf32>
    %136 = vector.shape_cast %135 : vector<1x128x128xf32> to vector<128x128xf32>
    %cst_154 = arith.constant dense<0.000000e+00> : vector<128x128xf32>
    %137 = tpu.matmul %134, %136, %cst_154 {dimension_numbers = #tpu.dot_dimension_numbers<[1], [0], [0], [1], [0, 0, 1, 1], [], []>} : vector<128x128xf32>, vector<128x128xf32>, vector<128x128xf32> -> vector<128x128xf32>
    %138 = arith.addf %132, %137 : vector<128x128xf32>
    %c0_155 = arith.constant 0 : index
    %c0_156 = arith.constant 0 : index
    %139 = vector.load %arg5[%c0_155, %c0_156] : memref<1x128xf32, #tpu.memory_space<vmem>>, vector<1x128xf32>
    %c0_157 = arith.constant 0 : index
    %c0_158 = arith.constant 0 : index
    %140 = vector.load %arg6[%c0_157, %c0_158] : memref<1x128xf32, #tpu.memory_space<vmem>>, vector<1x128xf32>
    %cst_159 = arith.constant dense<0.000000e+00> : vector<128xf32>
    %141 = vector.multi_reduction <add>, %138, %cst_159 [0] : vector<128x128xf32> to vector<128xf32>
    %142 = vector.shape_cast %141 : vector<128xf32> to vector<1x128xf32>
    %cst_160 = arith.constant 1.280000e+02 : f32
    %143 = vector.broadcast %cst_160 : f32 to vector<1x128xf32>
    %144 = arith.divf %142, %143 : vector<1x128xf32>
    %145 = vector.broadcast %144 : vector<1x128xf32> to vector<128x128xf32>
    %146 = arith.subf %138, %145 : vector<128x128xf32>
    %147 = arith.mulf %146, %146 : vector<128x128xf32>
    %cst_161 = arith.constant dense<0.000000e+00> : vector<128xf32>
    %148 = vector.multi_reduction <add>, %147, %cst_161 [0] : vector<128x128xf32> to vector<128xf32>
    %149 = vector.shape_cast %148 : vector<128xf32> to vector<1x128xf32>
    %cst_162 = arith.constant 1.280000e+02 : f32
    %150 = vector.broadcast %cst_162 : f32 to vector<1x128xf32>
    %151 = arith.divf %149, %150 : vector<1x128xf32>
    %cst_163 = arith.constant 9.99999974E-6 : f32
    %152 = vector.broadcast %cst_163 : f32 to vector<1x128xf32>
    %153 = arith.addf %151, %152 : vector<1x128xf32>
    %154 = math.rsqrt %153 : vector<1x128xf32>
    %155 = arith.mulf %139, %154 : vector<1x128xf32>
    %156 = arith.mulf %144, %155 : vector<1x128xf32>
    %157 = arith.subf %140, %156 : vector<1x128xf32>
    %158 = vector.broadcast %155 : vector<1x128xf32> to vector<128x128xf32>
    %159 = arith.mulf %138, %158 : vector<128x128xf32>
    %160 = vector.broadcast %157 : vector<1x128xf32> to vector<128x128xf32>
    %161 = arith.addf %159, %160 : vector<128x128xf32>
    %c0_164 = arith.constant 0 : index
    %c0_165 = arith.constant 0 : index
    %162 = vector.load %arg7[%c0_164, %c0_165] : memref<128x128xf32, #tpu.memory_space<vmem>>, vector<128x128xf32>
    tpu.vector_store %arg7[%c0_164, %c0_165], %161 {strides = array<i32>} : memref<128x128xf32, #tpu.memory_space<vmem>>, vector<128x128xf32>,
    return
  }
}

</mosaic_0001>

<bundles_post_ra>
// kernel: plain_forward.1
= control target key start
LH: loop header
LB: loop body
LE: loop exit
PB: predicated region body
PF: predicated region fallthrough
CT: control target
= control target key end

     0   :  { %s8564_s1 = inlined_call_operand.vmem [shape: f32[9,128,128], index: 1, kind: input, shape index: {}]   ;;  %s8565_s0 = inlined_call_operand.vmem [shape: f32[8,9,9,128], index: 0, kind: input, shape index: {}]   ;;  %s8566_s4 = inlined_call_operand.vmem [shape: f32[9,128,128], index: 4, kind: input, shape index: {}]   ;;  %s8567_s2 = inlined_call_operand.vmem [shape: f32[1,128], index: 2, kind: input, shape index: {}]   ;;  %s8568_s3 = inlined_call_operand.vmem [shape: f32[1,128], index: 3, kind: input, shape index: {}]   ;;  %s8569_s5 = inlined_call_operand.vmem [shape: f32[1,128], index: 5, kind: input, shape index: {}]   ;;  %s8570_s6 = inlined_call_operand.vmem [shape: f32[1,128], index: 6, kind: input, shape index: {}]   ;;  %s8571_s7 = inlined_call_operand.vmem [shape: f32[128,128], index: 7, kind: output, shape index: {}]  }
   0x1   :  { %v3822_v0 = vld [vmem:[%s8564_s1 + $0x80] sm:$0xff]  ;;  %v3823_v1 = vld [vmem:[%s8564_s1 + $0x88] sm:$0xff]  ;;  %v3824_v2 = vld [vmem:[%s8564_s1 + $0x90] sm:$0xff] }
   0x2   :  { %v5758_v3 = vpack.c.bf16 %v3823_v1, %v3822_v0  ;;  %v3825_v4 = vld [vmem:[%s8564_s1 + $0x98] sm:$0xff]  ;;  %v3826_v6 = vld [vmem:[%s8564_s1 + $0xa0] sm:$0xff]  ;;  %v3827_v7 = vld [vmem:[%s8564_s1 + $0xa8] sm:$0xff] }
   0x3   :  { %v5762_v5 = vpack.c.bf16 %v3825_v4, %v3824_v2  ;;  %v5766_v8 = vpack.c.bf16 %v3827_v7, %v3826_v6  ;;  %v3806_v9 = vld [vmem:[%s8565_s0 + $0x120] sm:$0xff]  ;;  %v3828_v10 = vld [vmem:[%s8564_s1 + $0xb0] sm:$0xff]  ;;  %v3829_v11 = vld [vmem:[%s8564_s1 + $0xb8] sm:$0xff] }
   0x4   :  { %5759 = vmatprep.subr.bf16.mxu0 %v5758_v3  ;;  %4782 = vmatprep.mubr.f32.mxu0 %v3806_v9  ;;  %v5770_v12 = vpack.c.bf16 %v3829_v11, %v3828_v10  ;;  %v3830_v13 = vld [vmem:[%s8564_s1 + $0xc0] sm:$0xff]  ;;  %v3831_v14 = vld [vmem:[%s8564_s1 + $0xc8] sm:$0xff]  ;;  %v3832_v16 = vld [vmem:[%s8564_s1 + $0xd0] sm:$0xff] }
   0x5   :  { %5761 = vmatpush3.bf16.msra.mxu0 %v5758_v3  ;;  %v5774_v15 = vpack.c.bf16 %v3831_v14, %v3830_v13  ;;  %v3833_v17 = vld [vmem:[%s8564_s1 + $0xd8] sm:$0xff]  ;;  %v3834_v19 = vld [vmem:[%s8564_s1 + $0xe0] sm:$0xff]  ;;  %v3835_v20 = vld [vmem:[%s8564_s1 + $0xe8] sm:$0xff] }
   0x6   :  { %5763 = vmatprep.subr.bf16.mxu0 %v5762_v5  ;;  %v5778_v18 = vpack.c.bf16 %v3833_v17, %v3832_v16  ;;  %v5782_v21 = vpack.c.bf16 %v3835_v20, %v3834_v19  ;;  %v3836_v22 = vld [vmem:[%s8564_s1 + $0xf0] sm:$0xff]  ;;  %v3837_v23 = vld [vmem:[%s8564_s1 + $0xf8] sm:$0xff]  ;;  %v42_v25 = vld [vmem:[%s8564_s1] sm:$0xff] }
   0x7   :  { %v5786_v24 = vpack.c.bf16 %v3837_v23, %v3836_v22  ;;  %v43_v26 = vld [vmem:[%s8564_s1 + $0x8] sm:$0xff]  ;;  %v44_v28 = vld [vmem:[%s8564_s1 + $0x10] sm:$0xff]  ;;  %v45_v29 = vld [vmem:[%s8564_s1 + $0x18] sm:$0xff] }
   0x8   :  { %v5790_v27 = vpack.c.bf16 %v43_v26, %v42_v25  ;;  %v6703_v30 = vld [vmem:[%s8565_s0 + $0x130] sm:$0xff]  ;;  %v6708_v31 = vld [vmem:[%s8565_s0 + $0x140] sm:$0xff]  ;;  %v5794_v32 = vpack.c.bf16 %v45_v29, %v44_v28  ;;  %v47_v34 = vld [vmem:[%s8564_s1 + $0x28] sm:$0xff] }
   0x9   :  { %5765 = vmatpush3.bf16.msra.mxu0 %v5762_v5  ;;  %v46_v33 = vld [vmem:[%s8564_s1 + $0x20] sm:$0xff]  ;;  %v6721_v35 = vld [vmem:[%s8565_s0 + $0x150] sm:$0xff]  ;;  %v49_v39 = vld [vmem:[%s8564_s1 + $0x38] sm:$0xff] }
   0xa   :  { %5767 = vmatprep.subr.bf16.mxu0 %v5766_v8  ;;  %v6726_v36 = vld [vmem:[%s8565_s0 + $0x160] sm:$0xff]  ;;  %v5798_v37 = vpack.c.bf16 %v47_v34, %v46_v33  ;;  %v48_v38 = vld [vmem:[%s8564_s1 + $0x30] sm:$0xff]  ;;  %v51_v44 = vld [vmem:[%s8564_s1 + $0x48] sm:$0xff] }
   0xb   :  { %v6739_v40 = vld [vmem:[%s8565_s0 + $0x170] sm:$0xff]  ;;  %v6744_v41 = vld [vmem:[%s8565_s0 + $0x180] sm:$0xff]  ;;  %v5802_v42 = vpack.c.bf16 %v49_v39, %v48_v38  ;;  %v53_v49 = vld [vmem:[%s8564_s1 + $0x58] sm:$0xff] }
   0xc   :  { %v50_v43 = vld [vmem:[%s8564_s1 + $0x40] sm:$0xff]  ;;  %v6757_v45 = vld [vmem:[%s8565_s0 + $0x190] sm:$0xff]  ;;  %v55_v54 = vld [vmem:[%s8564_s1 + $0x68] sm:$0xff] }
   0xd   :  { %5769 = vmatpush3.bf16.msra.mxu0 %v5766_v8  ;;  %v3814_v46 = vld [vmem:[%s8565_s0 + $0x1b0] sm:$0xff]  ;;  %v5806_v47 = vpack.c.bf16 %v51_v44, %v50_v43  ;;  %v6772_v50 = vld [vmem:[%s8565_s0 + $0x1c0] sm:$0xff]  ;;  %v57_v59 = vld [vmem:[%s8564_s1 + $0x78] sm:$0xff] }
   0xe   :  { %5771 = vmatprep.subr.bf16.mxu0 %v5770_v12  ;;  %v52_v48 = vld [vmem:[%s8564_s1 + $0x50] sm:$0xff]  ;;  %v54_v53 = vld [vmem:[%s8564_s1 + $0x60] sm:$0xff]  ;;  %v3839_v0 = vld [vmem:[%s8564_s1 + $0x108] sm:$0xff] }
   0xf   :  { %v6777_v51 = vld [vmem:[%s8565_s0 + $0x1d0] sm:$0xff]  ;;  %v5810_v52 = vpack.c.bf16 %v53_v49, %v52_v48  ;;  %v6790_v55 = vld [vmem:[%s8565_s0 + $0x1e0] sm:$0xff]  ;;  %v5814_v57 = vpack.c.bf16 %v55_v54, %v54_v53  ;;  %v3841_v5 = vld [vmem:[%s8564_s1 + $0x118] sm:$0xff] }
  0x10   :  { %v6795_v56 = vld [vmem:[%s8565_s0 + $0x1f0] sm:$0xff]  ;;  %v6808_v60 = vld [vmem:[%s8565_s0 + $0x200] sm:$0xff]  ;;  %v3843_v10 = vld [vmem:[%s8564_s1 + $0x128] sm:$0xff] }
  0x11   :  { %5773 = vmatpush3.bf16.msra.mxu0 %v5770_v12  ;;  %v56_v58 = vld [vmem:[%s8564_s1 + $0x70] sm:$0xff]  ;;  %v3838_v63 = vld [vmem:[%s8564_s1 + $0x100] sm:$0xff]  ;;  %v3847_v20 = vld [vmem:[%s8564_s1 + $0x148] sm:$0xff] }
  0x12   :  { %5775 = vmatprep.subr.bf16.mxu0 %v5774_v15  ;;  %v6813_v61 = vld [vmem:[%s8565_s0 + $0x210] sm:$0xff]  ;;  %v5818_v62 = vpack.c.bf16 %v57_v59, %v56_v58  ;;  %v6826_v1 = vld [vmem:[%s8565_s0 + $0x220] sm:$0xff]  ;;  %v5822_v3 = vpack.c.bf16 %v3839_v0, %v3838_v63  ;;  %v3849_v25 = vld [vmem:[%s8564_s1 + $0x158] sm:$0xff] }
  0x13   :  { %v26_v2 = vld [vmem:[%s8565_s0] sm:$0xff]  ;;  %v3840_v4 = vld [vmem:[%s8564_s1 + $0x110] sm:$0xff]  ;;  %v3853_v39 = vld [vmem:[%s8564_s1 + $0x178] sm:$0xff] }
  0x14   :  { %v6841_v6 = vld [vmem:[%s8565_s0 + $0x10] sm:$0xff]  ;;  %v6846_v7 = vld [vmem:[%s8565_s0 + $0x20] sm:$0xff]  ;;  %v5826_v8 = vpack.c.bf16 %v3841_v5, %v3840_v4  ;;  %v3873_v54 = vld [vmem:[%s8564_s1 + $0x198] sm:$0xff] }
  0x15   :  { %5777 = vmatpush3.bf16.msra.mxu0 %v5774_v15  ;;  %v3842_v9 = vld [vmem:[%s8564_s1 + $0x120] sm:$0xff]  ;;  %v6859_v11 = vld [vmem:[%s8565_s0 + $0x30] sm:$0xff]  ;;  %v3845_v15 = vld [vmem:[%s8564_s1 + $0x138] sm:$0xff] }
  0x16   :  { %5779 = vmatprep.subr.bf16.mxu0 %v5778_v18  ;;  %v6864_v12 = vld [vmem:[%s8565_s0 + $0x40] sm:$0xff]  ;;  %v5830_v13 = vpack.c.bf16 %v3843_v10, %v3842_v9  ;;  %v3844_v14 = vld [vmem:[%s8564_s1 + $0x130] sm:$0xff]  ;;  %v3875_v63 = vld [vmem:[%s8564_s1 + $0x1a8] sm:$0xff] }
  0x17   :  { %v6877_v16 = vld [vmem:[%s8565_s0 + $0x50] sm:$0xff]  ;;  %v6882_v17 = vld [vmem:[%s8565_s0 + $0x60] sm:$0xff]  ;;  %v3877_v5 = vld [vmem:[%s8564_s1 + $0x1b8] sm:$0xff] }
  0x18   :  { %v3846_v19 = vld [vmem:[%s8564_s1 + $0x140] sm:$0xff]  ;;  %v34_v22 = vld [vmem:[%s8565_s0 + $0x90] sm:$0xff] }
  0x19   :  { %5781 = vmatpush3.bf16.msra.mxu0 %v5778_v18  ;;  %v5834_v18 = vpack.c.bf16 %v3845_v15, %v3844_v14  ;;  %v5838_v23 = vpack.c.bf16 %v3847_v20, %v3846_v19  ;;  %v6910_v26 = vld [vmem:[%s8565_s0 + $0xa0] sm:$0xff]  ;;  %v6933_v34 = vld [vmem:[%s8565_s0 + $0xd0] sm:$0xff]  ;;  %v3879_v14 = vld [vmem:[%s8564_s1 + $0x1c8] sm:$0xff] }
  0x1a   :  { %5783 = vmatprep.subr.bf16.mxu0 %v5782_v21  ;;  %v3850_v29 = vld [vmem:[%s8564_s1 + $0x160] sm:$0xff]  ;;  %v3852_v38 = vld [vmem:[%s8564_s1 + $0x170] sm:$0xff] }
  0x1b   :  { %v6928_v33 = vld [vmem:[%s8565_s0 + $0xc0] sm:$0xff]  ;;  %v6951_v43 = vld [vmem:[%s8565_s0 + $0xf0] sm:$0xff]  ;;  %v5850_v44 = vpack.c.bf16 %v3853_v39, %v3852_v38 }
  0x1c   :  { %v6964_v48 = vld [vmem:[%s8565_s0 + $0x100] sm:$0xff]  ;;  %v3872_v53 = vld [vmem:[%s8564_s1 + $0x190] sm:$0xff] }
  0x1d   :  { %5785 = vmatpush3.bf16.msra.mxu0 %v5782_v21  ;;  %v6895_v21 = vld [vmem:[%s8565_s0 + $0x70] sm:$0xff]  ;;  %v382_v49 = vld [vmem:[%s8565_s0 + $0x1] sm:$0xff]  ;;  %v5858_v59 = vpack.c.bf16 %v3873_v54, %v3872_v53 }
  0x1e   :  { %5787 = vmatprep.subr.bf16.mxu0 %v5786_v24  ;;  %v6984_v58 = vld [vmem:[%s8565_s0 + $0x21] sm:$0xff]  ;;  %v6997_v0 = vld [vmem:[%s8565_s0 + $0x31] sm:$0xff] }
  0x1f   :  { %v3876_v4 = vld [vmem:[%s8564_s1 + $0x1b0] sm:$0xff]  ;;  %v7020_v9 = vld [vmem:[%s8565_s0 + $0x61] sm:$0xff] }
  0x20   :  { %v5866_v10 = vpack.c.bf16 %v3877_v5, %v3876_v4  ;;  %v7033_v15 = vld [vmem:[%s8565_s0 + $0x71] sm:$0xff]  ;;  %v3903_v53 = vld [vmem:[%s8564_s1 + $0x208] sm:$0xff]  ;;  %v3856_v5 = vld [vmem:[%s8565_s0 + $0x260] sm:$0xff] }
  0x21   :  { %5789 = vmatpush3.bf16.msra.mxu0 %v5786_v24  ;;  %v3848_v24 = vld [vmem:[%s8564_s1 + $0x150] sm:$0xff]  ;;  %v7102_v54 = vld [vmem:[%s8565_s0 + $0x101] sm:$0xff] }
  0x22   :  { %5791 = vmatprep.subr.bf16.mxu0 %v5790_v27  ;;  %v5842_v28 = vpack.c.bf16 %v3849_v25, %v3848_v24  ;;  %v3880_v20 = vld [vmem:[%s8564_s1 + $0x1d0] sm:$0xff] }
  0x23   :  { %v7053_v24 = vld [vmem:[%s8565_s0 + $0xb1] sm:$0xff] }
  0x24   :  { %4783 = vmatmul.mubr.f32.vlgmr.msra.gmra.mrb[0].mxu0 %v6703_v30  ;;  %v3884_v39 = vld [vmem:[%s8564_s1 + $0x1f0] sm:$0xff] }
  0x25   :  { %5793 = vmatpush3.bf16.msra.mxu0 %v5790_v27  ;;  %4785 = vmatprep.mubr.f32.mxu0 %v6708_v31  ;;  %v6915_v27 = vld [vmem:[%s8565_s0 + $0xb0] sm:$0xff] }
  0x26   :  { %5795 = vmatprep.subr.bf16.mxu0 %v5794_v32  ;;  %v3855_v4 = vld [vmem:[%s8565_s0 + $0x250] sm:$0xff] }
  0x28   :  { %4786 = vmatmul.mubr.f32.gmra.mrb[2].mxu0 %v6721_v35 }
  0x29   :  { %5797 = vmatpush3.bf16.msra.mxu0 %v5794_v32  ;;  %4788 = vmatprep.mubr.f32.mxu0 %v6726_v36  ;;  %v3851_v32 = vld [vmem:[%s8564_s1 + $0x168] sm:$0xff] }
  0x2a   :  { %5799 = vmatprep.subr.bf16.mxu0 %v5798_v37 }
  0x2c   :  { %4789 = vmatmul.mubr.f32.gmra.mrb[4].mxu0 %v6739_v40 }
  0x2d   :  { %5801 = vmatpush3.bf16.msra.mxu0 %v5798_v37  ;;  %4791 = vmatprep.mubr.f32.mxu0 %v6744_v41  ;;  %v5846_v37 = vpack.c.bf16 %v3851_v32, %v3850_v29  ;;  %v3883_v29 = vld [vmem:[%s8564_s1 + $0x1e8] sm:$0xff] }
  0x2e   :  { %5803 = vmatprep.subr.bf16.mxu0 %v5802_v42  ;;  %v7066_v32 = vld [vmem:[%s8565_s0 + $0xc1] sm:$0xff] }
  0x30   :  { %4792 = vmatmul.mubr.f32.gmra.mrb[6].mxu0 %v6757_v45 }
  0x31   :  { %5805 = vmatpush3.bf16.msra.mxu0 %v5802_v42  ;;  %4794 = vmatprep.mubr.f32.mxu0 %v3814_v46  ;;  %v6946_v42 = vld [vmem:[%s8565_s0 + $0xe0] sm:$0xff] }
  0x32   :  { %5807 = vmatprep.subr.bf16.mxu0 %v5806_v47  ;;  %v3870_v46 = vld [vmem:[%s8564_s1 + $0x180] sm:$0xff] }
  0x34   :  { %4795 = vmatmul.mubr.f32.gmra.mrb[8].mxu0 %v6772_v50 }
  0x35   :  { %5809 = vmatpush3.bf16.msra.mxu0 %v5806_v47  ;;  %4797 = vmatprep.mubr.f32.mxu0 %v6777_v51  ;;  %v3871_v47 = vld [vmem:[%s8564_s1 + $0x188] sm:$0xff] }
  0x36   :  { %5811 = vmatprep.subr.bf16.mxu0 %v5810_v52 }
  0x38   :  { %4798 = vmatmul.mubr.f32.gmra.mrb[10].mxu0 %v6790_v55 }
  0x39   :  { %5813 = vmatpush3.bf16.msra.mxu0 %v5810_v52  ;;  %4800 = vmatprep.mubr.f32.mxu0 %v6795_v56  ;;  %v5854_v52 = vpack.c.bf16 %v3871_v47, %v3870_v46  ;;  %v7084_v46 = vld [vmem:[%s8565_s0 + $0xe1] sm:$0xff]  ;;  %v7089_v47 = vld [vmem:[%s8565_s0 + $0xf1] sm:$0xff] }
  0x3a   :  { %5815 = vmatprep.subr.bf16.mxu0 %v5814_v57 }
  0x3c   :  { %4801 = vmatmul.mubr.f32.gmra.mrb[12].mxu0 %v6808_v60 }
  0x3d   :  { %5817 = vmatpush3.bf16.msra.mxu0 %v5814_v57  ;;  %4803 = vmatprep.mubr.f32.mxu0 %v6813_v61  ;;  %v6979_v57 = vld [vmem:[%s8565_s0 + $0x11] sm:$0xff] }
  0x3e   :  { %5819 = vmatprep.subr.bf16.mxu0 %v5818_v62 }
  0x40   :  { %4804 = vmatmul.mubr.f32.gmra.mrb[14].mxu0 %v6826_v1 }
  0x41   :  { %5821 = vmatpush3.bf16.msra.mxu0 %v5818_v62  ;;  %4838 = vmatprep.mubr.f32.mxu0 %v26_v2  ;;  %v3874_v62 = vld [vmem:[%s8564_s1 + $0x1a0] sm:$0xff] }
  0x42   :  { %5823 = vmatprep.subr.bf16.mxu0 %v5822_v3  ;;  %v7002_v2 = vld [vmem:[%s8565_s0 + $0x41] sm:$0xff] }
  0x44   :  { %4839 = vmatmul.mubr.f32.vlgmr.msra.gmra.mrb[0].mxu0 %v6841_v6 }
  0x45   :  { %5825 = vmatpush3.bf16.msra.mxu0 %v5822_v3  ;;  %4841 = vmatprep.mubr.f32.mxu0 %v6846_v7  ;;  %v5862_v3 = vpack.c.bf16 %v3875_v63, %v3874_v62  ;;  %v3904_v63 = vld [vmem:[%s8564_s1 + $0x210] sm:$0xff] }
  0x46   :  { %5827 = vmatprep.subr.bf16.mxu0 %v5826_v8 }
  0x48   :  { %4842 = vmatmul.mubr.f32.gmra.mrb[2].mxu0 %v6859_v11 }
  0x49   :  { %5829 = vmatpush3.bf16.msra.mxu0 %v5826_v8  ;;  %4844 = vmatprep.mubr.f32.mxu0 %v6864_v12  ;;  %v7015_v8 = vld [vmem:[%s8565_s0 + $0x51] sm:$0xff] }
  0x4a   :  { %5831 = vmatprep.subr.bf16.mxu0 %v5830_v13 }
  0x4c   :  { %4845 = vmatmul.mubr.f32.gmra.mrb[4].mxu0 %v6877_v16 }
  0x4d   :  { %5833 = vmatpush3.bf16.msra.mxu0 %v5830_v13  ;;  %4847 = vmatprep.mubr.f32.mxu0 %v6882_v17  ;;  %v3878_v13 = vld [vmem:[%s8564_s1 + $0x1c0] sm:$0xff] }
  0x4e   :  { %5835 = vmatprep.subr.bf16.mxu0 %v5834_v18  ;;  %v5870_v19 = vpack.c.bf16 %v3879_v14, %v3878_v13  ;;  %v3906_v13 = vld [vmem:[%s8564_s1 + $0x220] sm:$0xff]  ;;  %v3907_v14 = vld [vmem:[%s8564_s1 + $0x228] sm:$0xff] }
  0x50   :  { %4848 = vmatmul.mubr.f32.gmra.mrb[6].mxu0 %v6895_v21 }
  0x51   :  { %5837 = vmatpush3.bf16.msra.mxu0 %v5834_v18  ;;  %4850 = vmatprep.mubr.f32.mxu0 %v34_v22  ;;  %v390_v18 = vld [vmem:[%s8565_s0 + $0x91] sm:$0xff] }
  0x52   :  { %5839 = vmatprep.subr.bf16.mxu0 %v5838_v23  ;;  %v3881_v22 = vld [vmem:[%s8564_s1 + $0x1d8] sm:$0xff] }
  0x53   :  { %v5874_v25 = vpack.c.bf16 %v3881_v22, %v3880_v20  ;;  %v5894_v20 = vpack.c.bf16 %v3907_v14, %v3906_v13  ;;  %v3908_v22 = vld [vmem:[%s8564_s1 + $0x230] sm:$0xff]  ;;  %v3865_v13 = vld [vmem:[%s8565_s0 + $0x300] sm:$0xff] }
  0x54   :  { %4851 = vmatmul.mubr.f32.gmra.mrb[8].mxu0 %v6910_v26  ;;  %v3866_v14 = vld [vmem:[%s8565_s0 + $0x310] sm:$0xff] }
  0x55   :  { %5841 = vmatpush3.bf16.msra.mxu0 %v5838_v23  ;;  %4853 = vmatprep.mubr.f32.mxu0 %v6915_v27  ;;  %v7048_v23 = vld [vmem:[%s8565_s0 + $0xa1] sm:$0xff] }
  0x56   :  { %5843 = vmatprep.subr.bf16.mxu0 %v5842_v28 }
  0x58   :  { %4854 = vmatmul.mubr.f32.gmra.mrb[10].mxu0 %v6928_v33 }
  0x59   :  { %5845 = vmatpush3.bf16.msra.mxu0 %v5842_v28  ;;  %4856 = vmatprep.mubr.f32.mxu0 %v6933_v34  ;;  %v3882_v28 = vld [vmem:[%s8564_s1 + $0x1e0] sm:$0xff] }
  0x5a   :  { %5847 = vmatprep.subr.bf16.mxu0 %v5846_v37  ;;  %v5878_v38 = vpack.c.bf16 %v3883_v29, %v3882_v28  ;;  %v3859_v28 = vld [vmem:[%s8565_s0 + $0x290] sm:$0xff]  ;;  %v3860_v29 = vld [vmem:[%s8565_s0 + $0x2a0] sm:$0xff] }
  0x5c   :  { %4857 = vmatmul.mubr.f32.gmra.mrb[12].mxu0 %v6946_v42 }
  0x5d   :  { %5849 = vmatpush3.bf16.msra.mxu0 %v5846_v37  ;;  %4859 = vmatprep.mubr.f32.mxu0 %v6951_v43  ;;  %v7071_v37 = vld [vmem:[%s8565_s0 + $0xd1] sm:$0xff] }
  0x5e   :  { %5851 = vmatprep.subr.bf16.mxu0 %v5850_v44 }
  0x60   :  { %4860 = vmatmul.mubr.f32.gmra.mrb[14].mxu0 %v6964_v48 }
  0x61   :  { %5853 = vmatpush3.bf16.msra.mxu0 %v5850_v44  ;;  %4894 = vmatprep.mubr.f32.mxu0 %v382_v49  ;;  %v3885_v44 = vld [vmem:[%s8564_s1 + $0x1f8] sm:$0xff] }
  0x62   :  { %5855 = vmatprep.subr.bf16.mxu0 %v5854_v52  ;;  %v5882_v49 = vpack.c.bf16 %v3885_v44, %v3884_v39  ;;  %v3910_v39 = vld [vmem:[%s8564_s1 + $0x240] sm:$0xff]  ;;  %v3911_v44 = vld [vmem:[%s8564_s1 + $0x248] sm:$0xff] }
  0x64   :  { %4895 = vmatmul.mubr.f32.vlgmr.msra.gmra.mrb[0].mxu0 %v6979_v57 }
  0x65   :  { %5857 = vmatpush3.bf16.msra.mxu0 %v5854_v52  ;;  %4897 = vmatprep.mubr.f32.mxu0 %v6984_v58  ;;  %v3902_v52 = vld [vmem:[%s8564_s1 + $0x200] sm:$0xff] }
  0x66   :  { %5859 = vmatprep.subr.bf16.mxu0 %v5858_v59  ;;  %v5886_v62 = vpack.c.bf16 %v3903_v53, %v3902_v52  ;;  %v3862_v52 = vld [vmem:[%s8565_s0 + $0x2d0] sm:$0xff]  ;;  %v5902_v53 = vpack.c.bf16 %v3911_v44, %v3910_v39  ;;  %v3869_v39 = vld [vmem:[%s8565_s0 + $0x340] sm:$0xff] }
  0x67   :  { %v3886_v44 = vld [vmem:[%s8565_s0 + $0x360] sm:$0xff] }
  0x68   :  { %4898 = vmatmul.mubr.f32.gmra.mrb[2].mxu0 %v6997_v0 }
  0x69   :  { %5861 = vmatpush3.bf16.msra.mxu0 %v5858_v59  ;;  %4900 = vmatprep.mubr.f32.mxu0 %v7002_v2  ;;  %v3854_v59 = vld [vmem:[%s8565_s0 + $0x240] sm:$0xff] }
  0x6a   :  { %5863 = vmatprep.subr.bf16.mxu0 %v5862_v3 }
  0x6c   :  { %4901 = vmatmul.mubr.f32.gmra.mrb[4].mxu0 %v7015_v8 }
  0x6d   :  { %5865 = vmatpush3.bf16.msra.mxu0 %v5862_v3  ;;  %4903 = vmatprep.mubr.f32.mxu0 %v7020_v9  ;;  %v3905_v3 = vld [vmem:[%s8564_s1 + $0x218] sm:$0xff] }
  0x6e   :  { %5867 = vmatprep.subr.bf16.mxu0 %v5866_v10 }
  0x70   :  { %4904 = vmatmul.mubr.f32.gmra.mrb[6].mxu0 %v7033_v15 }
  0x71   :  { %5869 = vmatpush3.bf16.msra.mxu0 %v5866_v10  ;;  %4906 = vmatprep.mubr.f32.mxu0 %v390_v18  ;;  %v5890_v10 = vpack.c.bf16 %v3905_v3, %v3904_v63  ;;  %v3857_v18 = vld [vmem:[%s8565_s0 + $0x270] sm:$0xff]  ;;  %v3863_v63 = vld [vmem:[%s8565_s0 + $0x2e0] sm:$0xff] }
  0x72   :  { %5871 = vmatprep.subr.bf16.mxu0 %v5870_v19  ;;  %v3864_v3 = vld [vmem:[%s8565_s0 + $0x2f0] sm:$0xff] }
  0x74   :  { %4907 = vmatmul.mubr.f32.gmra.mrb[8].mxu0 %v7048_v23 }
  0x75   :  { %5873 = vmatpush3.bf16.msra.mxu0 %v5870_v19  ;;  %4909 = vmatprep.mubr.f32.mxu0 %v7053_v24  ;;  %v3858_v19 = vld [vmem:[%s8565_s0 + $0x280] sm:$0xff] }
  0x76   :  { %5875 = vmatprep.subr.bf16.mxu0 %v5874_v25 }
  0x78   :  { %4910 = vmatmul.mubr.f32.gmra.mrb[10].mxu0 %v7066_v32 }
  0x79   :  { %5877 = vmatpush3.bf16.msra.mxu0 %v5874_v25  ;;  %4912 = vmatprep.mubr.f32.mxu0 %v7071_v37  ;;  %v3909_v25 = vld [vmem:[%s8564_s1 + $0x238] sm:$0xff] }
  0x7a   :  { %5879 = vmatprep.subr.bf16.mxu0 %v5878_v38 }
  0x7c   :  { %4913 = vmatmul.mubr.f32.gmra.mrb[12].mxu0 %v7084_v46 }
  0x7d   :  { %5881 = vmatpush3.bf16.msra.mxu0 %v5878_v38  ;;  %4915 = vmatprep.mubr.f32.mxu0 %v7089_v47  ;;  %v5898_v38 = vpack.c.bf16 %v3909_v25, %v3908_v22  ;;  %v3867_v22 = vld [vmem:[%s8565_s0 + $0x320] sm:$0xff]  ;;  %v3868_v25 = vld [vmem:[%s8565_s0 + $0x330] sm:$0xff] }
  0x7e   :  { %5883 = vmatprep.subr.bf16.mxu0 %v5882_v49 }
  0x80   :  { %4916 = vmatmul.mubr.f32.gmra.mrb[14].mxu0 %v7102_v54 }
  0x81   :  { %5885 = vmatpush3.bf16.msra.mxu0 %v5882_v49  ;;  %4950 = vmatprep.mubr.f32.mxu0 %v3854_v59  ;;  %v3861_v49 = vld [vmem:[%s8565_s0 + $0x2b0] sm:$0xff] }
  0x82   :  { %5887 = vmatprep.subr.bf16.mxu0 %v5886_v62  ;;  %v3912_v59 = vld [vmem:[%s8564_s1 + $0x250] sm:$0xff] }
  0x84   :  { %4951 = vmatmul.mubr.f32.vlgmr.msra.gmra.mrb[0].mxu0 %v3855_v4 }
  0x85   :  { %5889 = vmatpush3.bf16.msra.mxu0 %v5886_v62  ;;  %4953 = vmatprep.mubr.f32.mxu0 %v3856_v5  ;;  %v3913_v62 = vld [vmem:[%s8564_s1 + $0x258] sm:$0xff]  ;;  %v3914_v5 = vld [vmem:[%s8564_s1 + $0x260] sm:$0xff] }
  0x86   :  { %5891 = vmatprep.subr.bf16.mxu0 %v5890_v10  ;;  %v5906_v4 = vpack.c.bf16 %v3913_v62, %v3912_v59  ;;  %v3887_v59 = vld [vmem:[%s8565_s0 + $0x370] sm:$0xff]  ;;  %v3888_v62 = vld [vmem:[%s8565_s0 + $0x380] sm:$0xff] }
  0x88   :  { %4954 = vmatmul.mubr.f32.gmra.mrb[2].mxu0 %v3857_v18 }
  0x89   :  { %5893 = vmatpush3.bf16.msra.mxu0 %v5890_v10  ;;  %4956 = vmatprep.mubr.f32.mxu0 %v3858_v19  ;;  %v3915_v10 = vld [vmem:[%s8564_s1 + $0x268] sm:$0xff]  ;;  %v3916_v19 = vld [vmem:[%s8564_s1 + $0x270] sm:$0xff] }
  0x8a   :  { %5895 = vmatprep.subr.bf16.mxu0 %v5894_v20  ;;  %v5910_v18 = vpack.c.bf16 %v3915_v10, %v3914_v5  ;;  %v3889_v5 = vld [vmem:[%s8565_s0 + $0x390] sm:$0xff]  ;;  %v3890_v10 = vld [vmem:[%s8565_s0 + $0x3a0] sm:$0xff] }
  0x8c   :  { %4957 = vmatmul.mubr.f32.gmra.mrb[4].mxu0 %v3859_v28 }
  0x8d   :  { %5897 = vmatpush3.bf16.msra.mxu0 %v5894_v20  ;;  %4959 = vmatprep.mubr.f32.mxu0 %v3860_v29  ;;  %v3917_v20 = vld [vmem:[%s8564_s1 + $0x278] sm:$0xff]  ;;  %v3934_v29 = vld [vmem:[%s8564_s1 + $0x280] sm:$0xff] }
  0x8e   :  { %5899 = vmatprep.subr.bf16.mxu0 %v5898_v38  ;;  %v5914_v28 = vpack.c.bf16 %v3917_v20, %v3916_v19  ;;  %v3891_v19 = vld [vmem:[%s8565_s0 + $0x3b0] sm:$0xff]  ;;  %v3892_v20 = vld [vmem:[%s8565_s0 + $0x3c0] sm:$0xff] }
  0x90   :  { %4960 = vmatmul.mubr.f32.gmra.mrb[6].mxu0 %v3861_v49 }
  0x91   :  { %5901 = vmatpush3.bf16.msra.mxu0 %v5898_v38  ;;  %4962 = vmatprep.mubr.f32.mxu0 %v3862_v52  ;;  %v3935_v38 = vld [vmem:[%s8564_s1 + $0x288] sm:$0xff]  ;;  %v3936_v52 = vld [vmem:[%s8564_s1 + $0x290] sm:$0xff] }
  0x92   :  { %5903 = vmatprep.subr.bf16.mxu0 %v5902_v53  ;;  %v5918_v49 = vpack.c.bf16 %v3935_v38, %v3934_v29  ;;  %v3893_v29 = vld [vmem:[%s8565_s0 + $0x3d0] sm:$0xff] }
  0x93   :  { %v3894_v38 = vld [vmem:[%s8565_s0 + $0x3f0] sm:$0xff] }
  0x94   :  { %4963 = vmatmul.mubr.f32.gmra.mrb[8].mxu0 %v3863_v63 }
  0x95   :  { %5905 = vmatpush3.bf16.msra.mxu0 %v5902_v53  ;;  %4965 = vmatprep.mubr.f32.mxu0 %v3864_v3  ;;  %v3937_v53 = vld [vmem:[%s8564_s1 + $0x298] sm:$0xff]  ;;  %v3938_v3 = vld [vmem:[%s8564_s1 + $0x2a0] sm:$0xff] }
  0x96   :  { %5907 = vmatprep.subr.bf16.mxu0 %v5906_v4  ;;  %v5922_v63 = vpack.c.bf16 %v3937_v53, %v3936_v52  ;;  %v3895_v52 = vld [vmem:[%s8565_s0 + $0x400] sm:$0xff]  ;;  %v3896_v53 = vld [vmem:[%s8565_s0 + $0x410] sm:$0xff] }
  0x98   :  { %4966 = vmatmul.mubr.f32.gmra.mrb[10].mxu0 %v3865_v13 }
  0x99   :  { %5909 = vmatpush3.bf16.msra.mxu0 %v5906_v4  ;;  %4968 = vmatprep.mubr.f32.mxu0 %v3866_v14  ;;  %v3939_v4 = vld [vmem:[%s8564_s1 + $0x2a8] sm:$0xff]  ;;  %v3940_v14 = vld [vmem:[%s8564_s1 + $0x2b0] sm:$0xff] }
  0x9a   :  { %5911 = vmatprep.subr.bf16.mxu0 %v5910_v18  ;;  %v5926_v13 = vpack.c.bf16 %v3939_v4, %v3938_v3  ;;  %v3897_v3 = vld [vmem:[%s8565_s0 + $0x420] sm:$0xff]  ;;  %v3898_v4 = vld [vmem:[%s8565_s0 + $0x430] sm:$0xff] }
  0x9c   :  { %4969 = vmatmul.mubr.f32.gmra.mrb[12].mxu0 %v3867_v22 }
  0x9d   :  { %5913 = vmatpush3.bf16.msra.mxu0 %v5910_v18  ;;  %4971 = vmatprep.mubr.f32.mxu0 %v3868_v25  ;;  %v3941_v18 = vld [vmem:[%s8564_s1 + $0x2b8] sm:$0xff]  ;;  %v3942_v25 = vld [vmem:[%s8564_s1 + $0x2c0] sm:$0xff] }
  0x9e   :  { %5915 = vmatprep.subr.bf16.mxu0 %v5914_v28  ;;  %v5930_v22 = vpack.c.bf16 %v3941_v18, %v3940_v14  ;;  %v3899_v14 = vld [vmem:[%s8565_s0 + $0x440] sm:$0xff]  ;;  %v3900_v18 = vld [vmem:[%s8565_s0 + $0x450] sm:$0xff] }
  0xa0   :  { %4972 = vmatmul.mubr.f32.gmra.mrb[14].mxu0 %v3869_v39 }
  0xa1   :  { %5917 = vmatpush3.bf16.msra.mxu0 %v5914_v28  ;;  %5006 = vmatprep.mubr.f32.mxu0 %v3886_v44  ;;  %v3943_v28 = vld [vmem:[%s8564_s1 + $0x2c8] sm:$0xff]  ;;  %v3944_v44 = vld [vmem:[%s8564_s1 + $0x2d0] sm:$0xff] }
  0xa2   :  { %5919 = vmatprep.subr.bf16.mxu0 %v5918_v49  ;;  %v5934_v39 = vpack.c.bf16 %v3943_v28, %v3942_v25  ;;  %v3901_v25 = vld [vmem:[%s8565_s0 + $0x460] sm:$0xff] }
  0xa3   :  { %v3918_v28 = vld [vmem:[%s8565_s0 + $0x241] sm:$0xff] }
  0xa4   :  { %5007 = vmatmul.mubr.f32.vlgmr.msra.gmra.mrb[0].mxu0 %v3887_v59 }
  0xa5   :  { %5921 = vmatpush3.bf16.msra.mxu0 %v5918_v49  ;;  %5009 = vmatprep.mubr.f32.mxu0 %v3888_v62  ;;  %v3945_v49 = vld [vmem:[%s8564_s1 + $0x2d8] sm:$0xff]  ;;  %v3946_v62 = vld [vmem:[%s8564_s1 + $0x2e0] sm:$0xff] }
  0xa6   :  { %5923 = vmatprep.subr.bf16.mxu0 %v5922_v63  ;;  %v5938_v59 = vpack.c.bf16 %v3945_v49, %v3944_v44  ;;  %v3919_v44 = vld [vmem:[%s8565_s0 + $0x251] sm:$0xff]  ;;  %v3920_v49 = vld [vmem:[%s8565_s0 + $0x261] sm:$0xff] }
  0xa8   :  { %5010 = vmatmul.mubr.f32.gmra.mrb[2].mxu0 %v3889_v5 }
  0xa9   :  { %5925 = vmatpush3.bf16.msra.mxu0 %v5922_v63  ;;  %5012 = vmatprep.mubr.f32.mxu0 %v3890_v10  ;;  %v3947_v63 = vld [vmem:[%s8564_s1 + $0x2e8] sm:$0xff]  ;;  %v3948_v10 = vld [vmem:[%s8564_s1 + $0x2f0] sm:$0xff] }
  0xaa   :  { %5927 = vmatprep.subr.bf16.mxu0 %v5926_v13  ;;  %v5942_v5 = vpack.c.bf16 %v3947_v63, %v3946_v62  ;;  %v3921_v62 = vld [vmem:[%s8565_s0 + $0x271] sm:$0xff]  ;;  %v3922_v63 = vld [vmem:[%s8565_s0 + $0x281] sm:$0xff] }
  0xac   :  { %5013 = vmatmul.mubr.f32.gmra.mrb[4].mxu0 %v3891_v19 }
  0xad   :  { %5929 = vmatpush3.bf16.msra.mxu0 %v5926_v13  ;;  %5015 = vmatprep.mubr.f32.mxu0 %v3892_v20  ;;  %v3949_v13 = vld [vmem:[%s8564_s1 + $0x2f8] sm:$0xff]  ;;  %v3966_v20 = vld [vmem:[%s8564_s1 + $0x300] sm:$0xff] }
  0xae   :  { %5931 = vmatprep.subr.bf16.mxu0 %v5930_v22  ;;  %v5946_v19 = vpack.c.bf16 %v3949_v13, %v3948_v10  ;;  %v3923_v10 = vld [vmem:[%s8565_s0 + $0x291] sm:$0xff]  ;;  %v3924_v13 = vld [vmem:[%s8565_s0 + $0x2a1] sm:$0xff] }
  0xb0   :  { %5016 = vmatmul.mubr.f32.gmra.mrb[6].mxu0 %v3893_v29 }
  0xb1   :  { %5933 = vmatpush3.bf16.msra.mxu0 %v5930_v22  ;;  %5018 = vmatprep.mubr.f32.mxu0 %v3894_v38  ;;  %v3967_v22 = vld [vmem:[%s8564_s1 + $0x308] sm:$0xff]  ;;  %v3968_v38 = vld [vmem:[%s8564_s1 + $0x310] sm:$0xff] }
  0xb2   :  { %5935 = vmatprep.subr.bf16.mxu0 %v5934_v39  ;;  %v5950_v29 = vpack.c.bf16 %v3967_v22, %v3966_v20  ;;  %v3925_v20 = vld [vmem:[%s8565_s0 + $0x2b1] sm:$0xff] }
  0xb3   :  { %v3926_v22 = vld [vmem:[%s8565_s0 + $0x2d1] sm:$0xff] }
  0xb4   :  { %5019 = vmatmul.mubr.f32.gmra.mrb[8].mxu0 %v3895_v52 }
  0xb5   :  { %5937 = vmatpush3.bf16.msra.mxu0 %v5934_v39  ;;  %5021 = vmatprep.mubr.f32.mxu0 %v3896_v53  ;;  %v3969_v39 = vld [vmem:[%s8564_s1 + $0x318] sm:$0xff]  ;;  %v3970_v53 = vld [vmem:[%s8564_s1 + $0x320] sm:$0xff] }
  0xb6   :  { %5939 = vmatprep.subr.bf16.mxu0 %v5938_v59  ;;  %v5954_v52 = vpack.c.bf16 %v3969_v39, %v3968_v38  ;;  %v3927_v38 = vld [vmem:[%s8565_s0 + $0x2e1] sm:$0xff]  ;;  %v3928_v39 = vld [vmem:[%s8565_s0 + $0x2f1] sm:$0xff] }
  0xb8   :  { %5022 = vmatmul.mubr.f32.gmra.mrb[10].mxu0 %v3897_v3 }
  0xb9   :  { %5941 = vmatpush3.bf16.msra.mxu0 %v5938_v59  ;;  %5024 = vmatprep.mubr.f32.mxu0 %v3898_v4  ;;  %v3971_v59 = vld [vmem:[%s8564_s1 + $0x328] sm:$0xff]  ;;  %v3972_v4 = vld [vmem:[%s8564_s1 + $0x330] sm:$0xff] }
  0xba   :  { %5943 = vmatprep.subr.bf16.mxu0 %v5942_v5  ;;  %v5958_v3 = vpack.c.bf16 %v3971_v59, %v3970_v53  ;;  %v3929_v53 = vld [vmem:[%s8565_s0 + $0x301] sm:$0xff]  ;;  %v3930_v59 = vld [vmem:[%s8565_s0 + $0x311] sm:$0xff] }
  0xbc   :  { %5025 = vmatmul.mubr.f32.gmra.mrb[12].mxu0 %v3899_v14 }
  0xbd   :  { %5945 = vmatpush3.bf16.msra.mxu0 %v5942_v5  ;;  %5027 = vmatprep.mubr.f32.mxu0 %v3900_v18  ;;  %v3973_v5 = vld [vmem:[%s8564_s1 + $0x338] sm:$0xff]  ;;  %v3974_v18 = vld [vmem:[%s8564_s1 + $0x340] sm:$0xff] }
  0xbe   :  { %5947 = vmatprep.subr.bf16.mxu0 %v5946_v19  ;;  %v5962_v14 = vpack.c.bf16 %v3973_v5, %v3972_v4  ;;  %v3931_v4 = vld [vmem:[%s8565_s0 + $0x321] sm:$0xff]  ;;  %v3932_v5 = vld [vmem:[%s8565_s0 + $0x331] sm:$0xff] }
  0xc0   :  { %5028 = vmatmul.mubr.f32.gmra.mrb[14].mxu0 %v3901_v25 }
  0xc1   :  { %5949 = vmatpush3.bf16.msra.mxu0 %v5946_v19  ;;  %5062 = vmatprep.mubr.f32.mxu0 %v3918_v28  ;;  %v3975_v19 = vld [vmem:[%s8564_s1 + $0x348] sm:$0xff]  ;;  %v3976_v28 = vld [vmem:[%s8564_s1 + $0x350] sm:$0xff] }
  0xc2   :  { %5951 = vmatprep.subr.bf16.mxu0 %v5950_v29  ;;  %v5966_v25 = vpack.c.bf16 %v3975_v19, %v3974_v18  ;;  %v3933_v18 = vld [vmem:[%s8565_s0 + $0x341] sm:$0xff] }
  0xc4   :  { %5063 = vmatmul.mubr.f32.vlgmr.msra.gmra.mrb[0].mxu0 %v3919_v44 }
  0xc5   :  { %5953 = vmatpush3.bf16.msra.mxu0 %v5950_v29  ;;  %5065 = vmatprep.mubr.f32.mxu0 %v3920_v49  ;;  %v3977_v29 = vld [vmem:[%s8564_s1 + $0x358] sm:$0xff]  ;;  %v3978_v49 = vld [vmem:[%s8564_s1 + $0x360] sm:$0xff] }
  0xc6   :  { %5955 = vmatprep.subr.bf16.mxu0 %v5954_v52  ;;  %v5970_v44 = vpack.c.bf16 %v3977_v29, %v3976_v28  ;;  %v4002_v28 = vld [vmem:[%s8564_s1 + $0x3a0] sm:$0xff]  ;;  %v4003_v29 = vld [vmem:[%s8564_s1 + $0x3a8] sm:$0xff] }
  0xc8   :  { %5066 = vmatmul.mubr.f32.gmra.mrb[2].mxu0 %v3921_v62 }
  0xc9   :  { %5957 = vmatpush3.bf16.msra.mxu0 %v5954_v52  ;;  %5068 = vmatprep.mubr.f32.mxu0 %v3922_v63  ;;  %v3979_v52 = vld [vmem:[%s8564_s1 + $0x368] sm:$0xff]  ;;  %v3980_v63 = vld [vmem:[%s8564_s1 + $0x370] sm:$0xff] }
  0xca   :  { %5959 = vmatprep.subr.bf16.mxu0 %v5958_v3  ;;  %v5974_v62 = vpack.c.bf16 %v3979_v52, %v3978_v49  ;;  %v4008_v49 = vld [vmem:[%s8564_s1 + $0x3d0] sm:$0xff]  ;;  %v4009_v52 = vld [vmem:[%s8564_s1 + $0x3d8] sm:$0xff] }
  0xcc   :  { %5069 = vmatmul.mubr.f32.gmra.mrb[4].mxu0 %v3923_v10 }
  0xcd   :  { %5961 = vmatpush3.bf16.msra.mxu0 %v5958_v3  ;;  %5071 = vmatprep.mubr.f32.mxu0 %v3924_v13  ;;  %v3981_v3 = vld [vmem:[%s8564_s1 + $0x378] sm:$0xff]  ;;  %v3998_v13 = vld [vmem:[%s8564_s1 + $0x380] sm:$0xff] }
  0xce   :  { %5963 = vmatprep.subr.bf16.mxu0 %v5962_v14  ;;  %v5978_v10 = vpack.c.bf16 %v3981_v3, %v3980_v63  ;;  %v4031_v63 = vld [vmem:[%s8564_s1 + $0x408] sm:$0xff]  ;;  %v4032_v3 = vld [vmem:[%s8564_s1 + $0x410] sm:$0xff] }
  0xd0   :  { %5072 = vmatmul.mubr.f32.gmra.mrb[6].mxu0 %v3925_v20  ;;  %v4000_v20 = vld [vmem:[%s8564_s1 + $0x390] sm:$0xff] }
  0xd1   :  { %5965 = vmatpush3.bf16.msra.mxu0 %v5962_v14  ;;  %5074 = vmatprep.mubr.f32.mxu0 %v3926_v22  ;;  %v3999_v14 = vld [vmem:[%s8564_s1 + $0x388] sm:$0xff]  ;;  %v4001_v22 = vld [vmem:[%s8564_s1 + $0x398] sm:$0xff] }
  0xd2   :  { %5967 = vmatprep.subr.bf16.mxu0 %v5966_v25  ;;  %v5982_v19 = vpack.c.bf16 %v3999_v14, %v3998_v13  ;;  %v4037_v13 = vld [vmem:[%s8564_s1 + $0x438] sm:$0xff]  ;;  %v4039_v14 = vld [vmem:[%s8564_s1 + $0x448] sm:$0xff] }
  0xd4   :  { %5075 = vmatmul.mubr.f32.gmra.mrb[8].mxu0 %v3927_v38  ;;  %v5990_v38 = vpack.c.bf16 %v4003_v29, %v4002_v28  ;;  %v4057_v28 = vld [vmem:[%s8566_s4 + $0xd8] sm:$0xff] }
  0xd5   :  { %5969 = vmatpush3.bf16.msra.mxu0 %v5966_v25  ;;  %5077 = vmatprep.mubr.f32.mxu0 %v3928_v39  ;;  %v5986_v25 = vpack.c.bf16 %v4001_v22, %v4000_v20  ;;  %v4005_v39 = vld [vmem:[%s8564_s1 + $0x3b8] sm:$0xff]  ;;  %v4043_v20 = vld [vmem:[%s8564_s1 + $0x468] sm:$0xff] }
  0xd6   :  { %5971 = vmatprep.subr.bf16.mxu0 %v5970_v44 }
  0xd8   :  { %5078 = vmatmul.mubr.f32.gmra.mrb[10].mxu0 %v3929_v53  ;;  %v4011_v53 = vld [vmem:[%s8564_s1 + $0x3e8] sm:$0xff] }
  0xd9   :  { %5973 = vmatpush3.bf16.msra.mxu0 %v5970_v44  ;;  %5080 = vmatprep.mubr.f32.mxu0 %v3930_v59  ;;  %v4007_v44 = vld [vmem:[%s8564_s1 + $0x3c8] sm:$0xff] }
  0xda   :  { %5975 = vmatprep.subr.bf16.mxu0 %v5974_v62 }
  0xdc   :  { %5081 = vmatmul.mubr.f32.gmra.mrb[12].mxu0 %v3931_v4  ;;  %v4033_v4 = vld [vmem:[%s8564_s1 + $0x418] sm:$0xff] }
  0xdd   :  { %5977 = vmatpush3.bf16.msra.mxu0 %v5974_v62  ;;  %5083 = vmatprep.mubr.f32.mxu0 %v3932_v5  ;;  %v4013_v62 = vld [vmem:[%s8564_s1 + $0x3f8] sm:$0xff]  ;;  %v4035_v5 = vld [vmem:[%s8564_s1 + $0x428] sm:$0xff] }
  0xde   :  { %5979 = vmatprep.subr.bf16.mxu0 %v5978_v10 }
  0xe0   :  { %5084 = vmatmul.mubr.f32.gmra.mrb[14].mxu0 %v3933_v18  ;;  %v4040_v18 = vld [vmem:[%s8564_s1 + $0x450] sm:$0xff] }
  0xe1   :  { %5981 = vmatpush3.bf16.msra.mxu0 %v5978_v10  ;;  %5118 = vmatprep.mubr.f32.mxu0 %v6841_v6  ;;  %v4004_v6 = vld [vmem:[%s8564_s1 + $0x3b0] sm:$0xff] }
  0xe2   :  { %5983 = vmatprep.subr.bf16.mxu0 %v5982_v19 }
  0xe4   :  { %5119 = vmatmul.mubr.f32.vlgmr.msra.gmra.mrb[0].mxu0 %v6846_v7  ;;  %v5994_v7 = vpack.c.bf16 %v4005_v39, %v4004_v6  ;;  %v4059_v6 = vld [vmem:[%s8566_s4 + $0xe8] sm:$0xff] }
  0xe5   :  { %5985 = vmatpush3.bf16.msra.mxu0 %v5982_v19  ;;  %5121 = vmatprep.mubr.f32.mxu0 %v6859_v11  ;;  %v4006_v11 = vld [vmem:[%s8564_s1 + $0x3c0] sm:$0xff]  ;;  %v4041_v19 = vld [vmem:[%s8564_s1 + $0x458] sm:$0xff] }
  0xe6   :  { %5987 = vmatprep.subr.bf16.mxu0 %v5986_v25 }
  0xe8   :  { %5122 = vmatmul.mubr.f32.gmra.mrb[2].mxu0 %v6864_v12  ;;  %v3957_v12 = vld [vmem:[%s8565_s0 + $0x80] sm:$0xff] }
  0xe9   :  { %5989 = vmatpush3.bf16.msra.mxu0 %v5986_v25  ;;  %5124 = vmatprep.mubr.f32.mxu0 %v6877_v16  ;;  %v5998_v16 = vpack.c.bf16 %v4007_v44, %v4006_v11  ;;  %v4045_v25 = vld [vmem:[%s8564_s1 + $0x478] sm:$0xff]  ;;  %v4060_v11 = vld [vmem:[%s8566_s4 + $0xf0] sm:$0xff] }
  0xea   :  { %5991 = vmatprep.subr.bf16.mxu0 %v5990_v38  ;;  %v4061_v44 = vld [vmem:[%s8566_s4 + $0xf8] sm:$0xff] }
  0xec   :  { %5125 = vmatmul.mubr.f32.gmra.mrb[4].mxu0 %v6882_v17  ;;  %v6002_v17 = vpack.c.bf16 %v4009_v52, %v4008_v49  ;;  %v1962_v49 = vld [vmem:[%s8566_s4 + $0x8] sm:$0xff] }
  0xed   :  { %5993 = vmatpush3.bf16.msra.mxu0 %v5990_v38  ;;  %5127 = vmatprep.mubr.f32.mxu0 %v6895_v21  ;;  %v4010_v21 = vld [vmem:[%s8564_s1 + $0x3e0] sm:$0xff] }
  0xee   :  { %5995 = vmatprep.subr.bf16.mxu0 %v5994_v7  ;;  %v6006_v59 = vpack.c.bf16 %v4011_v53, %v4010_v21  ;;  %v4058_v38 = vld [vmem:[%s8566_s4 + $0xe0] sm:$0xff] }
  0xef   :  { %v6070_v39 = vpack.c.bf16 %v4059_v6, %v4058_v38 }
  0xf0   :  { %5128 = vmatmul.mubr.f32.gmra.mrb[6].mxu0 %v3957_v12  ;;  %v6074_v12 = vpack.c.bf16 %v4061_v44, %v4060_v11 }
  0xf1   :  { %5997 = vmatpush3.bf16.msra.mxu0 %v5994_v7  ;;  %5130 = vmatprep.mubr.f32.mxu0 %v6910_v26  ;;  %v4012_v26 = vld [vmem:[%s8564_s1 + $0x3f0] sm:$0xff]  ;;  %v6596_v7 = vmov 0.0  }
  0xf2   :  { %5999 = vmatprep.subr.bf16.mxu0 %v5998_v16  ;;  %1922 = vst [vmem:[#allocation2 + $0x110] sm:$0xff] %v6596_v7  ;;  %1923 = vst [vmem:[#allocation2 + $0x118] sm:$0x3] %v6596_v7 }
  0xf3   :  { %1888 = vst [vmem:[#allocation2] sm:$0xff] %v6596_v7  ;;  %1889 = vst [vmem:[#allocation2 + $0x8] sm:$0x3] %v6596_v7 }
  0xf4   :  { %5131 = vmatmul.mubr.f32.gmra.mrb[8].mxu0 %v6915_v27  ;;  %v6010_v27 = vpack.c.bf16 %v4013_v62, %v4012_v26  ;;  %1890 = vst [vmem:[#allocation2 + $0x10] sm:$0xff] %v6596_v7  ;;  %1891 = vst [vmem:[#allocation2 + $0x18] sm:$0x3] %v6596_v7 }
  0xf5   :  { %6001 = vmatpush3.bf16.msra.mxu0 %v5998_v16  ;;  %5133 = vmatprep.mubr.f32.mxu0 %v6928_v33  ;;  %v4030_v33 = vld [vmem:[%s8564_s1 + $0x400] sm:$0xff]  ;;  %1892 = vst [vmem:[#allocation2 + $0x20] sm:$0xff] %v6596_v7  ;;  %1893 = vst [vmem:[#allocation2 + $0x28] sm:$0x3] %v6596_v7 }
  0xf6   :  { %6003 = vmatprep.subr.bf16.mxu0 %v6002_v17  ;;  %1894 = vst [vmem:[#allocation2 + $0x30] sm:$0xff] %v6596_v7  ;;  %1895 = vst [vmem:[#allocation2 + $0x38] sm:$0x3] %v6596_v7  ;;  %v1961_v16 = vld [vmem:[%s8566_s4] sm:$0xff] }
  0xf7   :  { %1896 = vst [vmem:[#allocation2 + $0x40] sm:$0xff] %v6596_v7  ;;  %1897 = vst [vmem:[#allocation2 + $0x48] sm:$0x3] %v6596_v7 }
  0xf8   :  { %5134 = vmatmul.mubr.f32.gmra.mrb[10].mxu0 %v6933_v34  ;;  %v3965_v34 = vld [vmem:[%s8565_s0 + $0x110] sm:$0xff]  ;;  %1898 = vst [vmem:[#allocation2 + $0x50] sm:$0xff] %v6596_v7  ;;  %1899 = vst [vmem:[#allocation2 + $0x58] sm:$0x3] %v6596_v7 }
  0xf9   :  { %6005 = vmatpush3.bf16.msra.mxu0 %v6002_v17  ;;  %5136 = vmatprep.mubr.f32.mxu0 %v6946_v42  ;;  %v6014_v42 = vpack.c.bf16 %v4031_v63, %v4030_v33  ;;  %1900 = vst [vmem:[#allocation2 + $0x60] sm:$0xff] %v6596_v7  ;;  %1901 = vst [vmem:[#allocation2 + $0x68] sm:$0x3] %v6596_v7  ;;  %v7637_v17 = vpack.c.bf16 %v1962_v49, %v1961_v16 }
  0xfa   :  { %6007 = vmatprep.subr.bf16.mxu0 %v6006_v59  ;;  %1902 = vst [vmem:[#allocation2 + $0x70] sm:$0xff] %v6596_v7  ;;  %1903 = vst [vmem:[#allocation2 + $0x78] sm:$0x3] %v6596_v7  ;;  %v1977_v52 = vld [vmem:[#allocation2 + $0x1] sm:$0xff] }
  0xfb   :  { %1904 = vst [vmem:[#allocation2 + $0x80] sm:$0xff] %v6596_v7  ;;  %1905 = vst [vmem:[#allocation2 + $0x88] sm:$0x3] %v6596_v7  ;;  %5286 = vmatprep.mubr.f32.mxu1 %v1977_v52 }
  0xfc   :  { %5137 = vmatmul.mubr.f32.gmra.mrb[12].mxu0 %v6951_v43  ;;  %v6018_v43 = vpack.c.bf16 %v4033_v4, %v4032_v3  ;;  %1906 = vst [vmem:[#allocation2 + $0x90] sm:$0xff] %v6596_v7  ;;  %1907 = vst [vmem:[#allocation2 + $0x98] sm:$0x3] %v6596_v7 }
  0xfd   :  { %6009 = vmatpush3.bf16.msra.mxu0 %v6006_v59  ;;  %5139 = vmatprep.mubr.f32.mxu0 %v6964_v48  ;;  %v4034_v48 = vld [vmem:[%s8564_s1 + $0x420] sm:$0xff]  ;;  %1908 = vst [vmem:[#allocation2 + $0xa0] sm:$0xff] %v6596_v7  ;;  %1909 = vst [vmem:[#allocation2 + $0xa8] sm:$0x3] %v6596_v7 }
  0xfe   :  { %6011 = vmatprep.subr.bf16.mxu0 %v6010_v27  ;;  %v6022_v10 = vpack.c.bf16 %v4035_v5, %v4034_v48  ;;  %1910 = vst [vmem:[#allocation2 + $0xb0] sm:$0xff] %v6596_v7  ;;  %1911 = vst [vmem:[#allocation2 + $0xb8] sm:$0x3] %v6596_v7 }
  0xff   :  { %1912 = vst [vmem:[#allocation2 + $0xc0] sm:$0xff] %v6596_v7  ;;  %1913 = vst [vmem:[#allocation2 + $0xc8] sm:$0x3] %v6596_v7 }
 0x100   :  { %5140 = vmatmul.mubr.f32.gmra.mrb[14].mxu0 %v3965_v34  ;;  %1914 = vst [vmem:[#allocation2 + $0xd0] sm:$0xff] %v6596_v7  ;;  %1915 = vst [vmem:[#allocation2 + $0xd8] sm:$0x3] %v6596_v7 }
 0x101   :  { %6013 = vmatpush3.bf16.msra.mxu0 %v6010_v27  ;;  %5174 = vmatprep.mubr.f32.mxu0 %v6703_v30  ;;  %v4036_v30 = vld [vmem:[%s8564_s1 + $0x430] sm:$0xff]  ;;  %1916 = vst [vmem:[#allocation2 + $0xe0] sm:$0xff] %v6596_v7  ;;  %1917 = vst [vmem:[#allocation2 + $0xe8] sm:$0x3] %v6596_v7 }
 0x102   :  { %6015 = vmatprep.subr.bf16.mxu0 %v6014_v42  ;;  %1918 = vst [vmem:[#allocation2 + $0xf0] sm:$0xff] %v6596_v7  ;;  %1919 = vst [vmem:[#allocation2 + $0xf8] sm:$0x3] %v6596_v7 }
 0x103   :  { %1920 = vst [vmem:[#allocation2 + $0x100] sm:$0xff] %v6596_v7  ;;  %1921 = vst [vmem:[#allocation2 + $0x108] sm:$0x3] %v6596_v7 }
 0x104   :  { %5175 = vmatmul.mubr.f32.vlgmr.msra.gmra.mrb[0].mxu0 %v6708_v31  ;;  %v6026_v31 = vpack.c.bf16 %v4037_v13, %v4036_v30  ;;  %1924 = vst [vmem:[#allocation2 + $0x120] sm:$0xff] %v6596_v7  ;;  %1925 = vst [vmem:[#allocation2 + $0x128] sm:$0x3] %v6596_v7 }
 0x105   :  { %6017 = vmatpush3.bf16.msra.mxu0 %v6014_v42  ;;  %5177 = vmatprep.mubr.f32.mxu0 %v6721_v35  ;;  %v4038_v35 = vld [vmem:[%s8564_s1 + $0x440] sm:$0xff]  ;;  %1926 = vst [vmem:[#allocation2 + $0x130] sm:$0xff] %v6596_v7  ;;  %1927 = vst [vmem:[#allocation2 + $0x138] sm:$0x3] %v6596_v7 }
 0x106   :  { %6019 = vmatprep.subr.bf16.mxu0 %v6018_v43 }
 0x108   :  { %5178 = vmatmul.mubr.f32.gmra.mrb[2].mxu0 %v6726_v36  ;;  %v3989_v36 = vld [vmem:[%s8565_s0 + $0x1a0] sm:$0xff] }
 0x109   :  { %6021 = vmatpush3.bf16.msra.mxu0 %v6018_v43  ;;  %5180 = vmatprep.mubr.f32.mxu0 %v6739_v40  ;;  %v6030_v40 = vpack.c.bf16 %v4039_v14, %v4038_v35 }
 0x10a   :  { %6023 = vmatprep.subr.bf16.mxu0 %v6022_v10 }
 0x10c   :  { %5181 = vmatmul.mubr.f32.gmra.mrb[4].mxu0 %v6744_v41  ;;  %v6034_v41 = vpack.c.bf16 %v4041_v19, %v4040_v18 }
 0x10d   :  { %6025 = vmatpush3.bf16.msra.mxu0 %v6022_v10  ;;  %5183 = vmatprep.mubr.f32.mxu0 %v6757_v45  ;;  %v4042_v45 = vld [vmem:[%s8564_s1 + $0x460] sm:$0xff] }
 0x10e   :  { %6027 = vmatprep.subr.bf16.mxu0 %v6026_v31  ;;  %v6038_v22 = vpack.c.bf16 %v4043_v20, %v4042_v45 }
 0x110   :  { %5184 = vmatmul.mubr.f32.gmra.mrb[6].mxu0 %v3989_v36 }
 0x111   :  { %6029 = vmatpush3.bf16.msra.mxu0 %v6026_v31  ;;  %5186 = vmatprep.mubr.f32.mxu0 %v6772_v50  ;;  %v4044_v50 = vld [vmem:[%s8564_s1 + $0x470] sm:$0xff] }
 0x112   :  { %6031 = vmatprep.subr.bf16.mxu0 %v6030_v40 }
 0x114   :  { %5187 = vmatmul.mubr.f32.gmra.mrb[8].mxu0 %v6777_v51  ;;  %v6042_v51 = vpack.c.bf16 %v4045_v25, %v4044_v50 }
 0x115   :  { %6033 = vmatpush3.bf16.msra.mxu0 %v6030_v40  ;;  %5189 = vmatprep.mubr.f32.mxu0 %v6790_v55  ;;  %v3997_v55 = vld [vmem:[%s8565_s0 + $0x230] sm:$0xff] }
 0x116   :  { %6035 = vmatprep.subr.bf16.mxu0 %v6034_v41 }
 0x118   :  { %5190 = vmatmul.mubr.f32.gmra.mrb[10].mxu0 %v6795_v56  ;;  %v4021_v56 = vld [vmem:[%s8565_s0 + $0x81] sm:$0xff] }
 0x119   :  { %6037 = vmatpush3.bf16.msra.mxu0 %v6034_v41  ;;  %5192 = vmatprep.mubr.f32.mxu0 %v6808_v60  ;;  %v4029_v60 = vld [vmem:[%s8565_s0 + $0x111] sm:$0xff] }
 0x11a   :  { %6039 = vmatprep.subr.bf16.mxu0 %v6038_v22 }
 0x11c   :  { %5193 = vmatmul.mubr.f32.gmra.mrb[12].mxu0 %v6813_v61  ;;  %v4046_v61 = vld [vmem:[%s8566_s4 + $0x80] sm:$0xff] }
 0x11d   :  { %6041 = vmatpush3.bf16.msra.mxu0 %v6038_v22  ;;  %5195 = vmatprep.mubr.f32.mxu0 %v6826_v1  ;;  %v4047_v1 = vld [vmem:[%s8566_s4 + $0x88] sm:$0xff] }
 0x11e   :  { %6043 = vmatprep.subr.bf16.mxu0 %v6042_v51 }
 0x120   :  { %5196 = vmatmul.mubr.f32.gmra.mrb[14].mxu0 %v3997_v55 }
 0x121   :  { %6045 = vmatpush3.bf16.msra.mxu0 %v6042_v51  ;;  %5230 = vmatprep.mubr.f32.mxu0 %v6979_v57  ;;  %v6046_v57 = vpack.c.bf16 %v4047_v1, %v4046_v61 }
 0x123   :  { %6047 = vmatprep.subr.bf16.mxu1 %v6046_v57 }
 0x124   :  { %5231 = vmatmul.mubr.f32.vlgmr.msra.gmra.mrb[0].mxu0 %v6984_v58  ;;  %6049 = vmatpush3.bf16.msra.mxu1 %v6046_v57  ;;  %v4048_v58 = vld [vmem:[%s8566_s4 + $0x90] sm:$0xff] }
 0x125   :  { %5233 = vmatprep.mubr.f32.mxu0 %v6997_v0  ;;  %v4049_v0 = vld [vmem:[%s8566_s4 + $0x98] sm:$0xff] }
 0x128   :  { %5234 = vmatmul.mubr.f32.gmra.mrb[2].mxu0 %v7002_v2  ;;  %v6050_v2 = vpack.c.bf16 %v4049_v0, %v4048_v58 }
 0x129   :  { %5236 = vmatprep.mubr.f32.mxu0 %v7015_v8  ;;  %v4050_v8 = vld [vmem:[%s8566_s4 + $0xa0] sm:$0xff] }
 0x12a   :  { %6051 = vmatprep.subr.bf16.mxu1 %v6050_v2 }
 0x12b   :  { %6053 = vmatpush3.bf16.msra.mxu1 %v6050_v2 }
 0x12c   :  { %5237 = vmatmul.mubr.f32.gmra.mrb[4].mxu0 %v7020_v9  ;;  %v4051_v9 = vld [vmem:[%s8566_s4 + $0xa8] sm:$0xff] }
 0x12d   :  { %5239 = vmatprep.mubr.f32.mxu0 %v7033_v15  ;;  %v6054_v15 = vpack.c.bf16 %v4051_v9, %v4050_v8 }
 0x12f   :  { %6055 = vmatprep.subr.bf16.mxu1 %v6054_v15 }
 0x130   :  { %5240 = vmatmul.mubr.f32.gmra.mrb[6].mxu0 %v4021_v56  ;;  %6057 = vmatpush3.bf16.msra.mxu1 %v6054_v15 }
 0x131   :  { %5242 = vmatprep.mubr.f32.mxu0 %v7048_v23  ;;  %v4052_v23 = vld [vmem:[%s8566_s4 + $0xb0] sm:$0xff] }
 0x134   :  { %5243 = vmatmul.mubr.f32.gmra.mrb[8].mxu0 %v7053_v24  ;;  %v4053_v24 = vld [vmem:[%s8566_s4 + $0xb8] sm:$0xff] }
 0x135   :  { %5245 = vmatprep.mubr.f32.mxu0 %v7066_v32  ;;  %v6058_v32 = vpack.c.bf16 %v4053_v24, %v4052_v23 }
 0x137   :  { %6059 = vmatprep.subr.bf16.mxu1 %v6058_v32 }
 0x138   :  { %5246 = vmatmul.mubr.f32.gmra.mrb[10].mxu0 %v7071_v37  ;;  %6061 = vmatpush3.bf16.msra.mxu1 %v6058_v32  ;;  %v4054_v37 = vld [vmem:[%s8566_s4 + $0xc0] sm:$0xff] }
 0x139   :  { %5248 = vmatprep.mubr.f32.mxu0 %v7084_v46  ;;  %v4055_v46 = vld [vmem:[%s8566_s4 + $0xc8] sm:$0xff] }
 0x13c   :  { %5249 = vmatmul.mubr.f32.gmra.mrb[12].mxu0 %v7089_v47  ;;  %v6062_v47 = vpack.c.bf16 %v4055_v46, %v4054_v37 }
 0x13d   :  { %5251 = vmatprep.mubr.f32.mxu0 %v7102_v54  ;;  %v4056_v54 = vld [vmem:[%s8566_s4 + $0xd0] sm:$0xff] }
 0x13e   :  { %6063 = vmatprep.subr.bf16.mxu1 %v6062_v47  ;;  %v6066_v29 = vpack.c.bf16 %v4057_v28, %v4056_v54 }
 0x13f   :  { %6065 = vmatpush3.bf16.msra.mxu1 %v6062_v47 }
 0x140   :  { %5252 = vmatmul.mubr.f32.gmra.mrb[14].mxu0 %v4029_v60  ;;  %6067 = vmatprep.subr.bf16.mxu1 %v6066_v29 }
 0x143   :  { %6069 = vmatpush3.bf16.msra.mxu1 %v6066_v29 }
 0x144   :  { %6071 = vmatprep.subr.bf16.mxu1 %v6070_v39 }
 0x147   :  { %6073 = vmatpush3.bf16.msra.mxu1 %v6070_v39 }
 0x148   :  { %6075 = vmatprep.subr.bf16.mxu1 %v6074_v12 }
 0x14b   :  { %6077 = vmatpush3.bf16.msra.mxu1 %v6074_v12 }
 0x14c   :  { %6079 = vmatprep.subr.bf16.mxu1 %v7637_v17 }
 0x1f7   :  { %v7640_v21 = vpop.f32.mrb[0].mxu0 }
 0x1f8   :  { %v7642_v53 = vpop.f32.mrb[1].mxu0 }
 0x1f9   :  { %v1746_v59 = vadd.f32 %v7640_v21, %v7642_v53 }
 0x1fb   :  { %v7646_v26 = vpop.f32.mrb[2].mxu0 }
 0x1fc   :  { %v7648_v62 = vpop.f32.mrb[3].mxu0 }
 0x1fd   :  { %v1747_v27 = vadd.f32 %v1746_v59, %v7648_v62 }
 0x1ff   :  { %v7651_v33 = vpop.f32.mrb[4].mxu0  ;;  %v1748_v63 = vadd.f32 %v7646_v26, %v1747_v27 }
 0x200   :  { %v7654_v34 = vpop.f32.mrb[5].mxu0 }
 0x201   :  { %v1749_v42 = vadd.f32 %v1748_v63, %v7654_v34 }
 0x203   :  { %v7657_v3 = vpop.f32.mrb[6].mxu0  ;;  %v1750_v4 = vadd.f32 %v7651_v33, %v1749_v42 }
 0x204   :  { %v7660_v43 = vpop.f32.mrb[7].mxu0 }
 0x205   :  { %v1751_v48 = vadd.f32 %v1750_v4, %v7660_v43 }
 0x207   :  { %v7663_v5 = vpop.f32.mrb[8].mxu0  ;;  %v1752_v10 = vadd.f32 %v7657_v3, %v1751_v48 }
 0x208   :  { %v7666_v30 = vpop.f32.mrb[9].mxu0 }
 0x209   :  { %v1753_v13 = vadd.f32 %v1752_v10, %v7666_v30 }
 0x20b   :  { %v7669_v31 = vpop.f32.mrb[10].mxu0  ;;  %v1754_v35 = vadd.f32 %v7663_v5, %v1753_v13 }
 0x20c   :  { %v7672_v14 = vpop.f32.mrb[11].mxu0 }
 0x20d   :  { %v1755_v36 = vadd.f32 %v1754_v35, %v7672_v14 }
 0x20f   :  { %v7675_v40 = vpop.f32.mrb[12].mxu0  ;;  %v1756_v18 = vadd.f32 %v7669_v31, %v1755_v36 }
 0x210   :  { %v7678_v19 = vpop.f32.mrb[13].mxu0 }
 0x211   :  { %v1757_v41 = vadd.f32 %v1756_v18, %v7678_v19 }
 0x213   :  { %v7681_v45 = vpop.f32.mrb[14].mxu0  ;;  %v1758_v20 = vadd.f32 %v7675_v40, %v1757_v41 }
 0x214   :  { %v7684_v22 = vpop.f32.mrb[15].mxu0 }
 0x215   :  { %v1759_v50 = vadd.f32 %v1758_v20, %v7684_v22 }
 0x217   :  { %v1760_v25 = vadd.f32 %v7681_v45, %v1759_v50 }
 0x219   :  { %v1761_v51 = vrot.slane %v1760_v25, 4 }
 0x21b   :  { %v1762_v55 = vadd.f32 %v1761_v51, %v1760_v25 }
 0x21d   :  { %v1763_v56 = vrot.slane %v1762_v55, 2 }
 0x21f   :  { %v1764_v60 = vadd.f32 %v1763_v56, %v1762_v55 }
 0x221   :  { %v1765_v61 = vrot.slane %v1764_v60, 1 }
 0x223   :  { %v1766_v1 = vadd.f32 %v1765_v61, %v1764_v60 }
 0x225   :  { %v7688_v57 = vmul.f32 0.0078125, %v1766_v1 }
 0x227   :  { %v1769_v58 = vsub.f32 %v7642_v53, %v7688_v57  ;;  %v1770_v0 = vsub.f32 %v7640_v21, %v7688_v57  ;;  %v1771_v2 = vsub.f32 %v7648_v62, %v7688_v57  ;;  %v1772_v8 = vsub.f32 %v7646_v26, %v7688_v57 }
 0x228   :  { %v1773_v9 = vsub.f32 %v7654_v34, %v7688_v57  ;;  %v1774_v15 = vsub.f32 %v7651_v33, %v7688_v57  ;;  %v1775_v23 = vsub.f32 %v7660_v43, %v7688_v57  ;;  %v1776_v24 = vsub.f32 %v7657_v3, %v7688_v57 }
 0x229   :  { %v1777_v32 = vsub.f32 %v7666_v30, %v7688_v57  ;;  %v1778_v37 = vsub.f32 %v7663_v5, %v7688_v57  ;;  %v1779_v46 = vsub.f32 %v7672_v14, %v7688_v57  ;;  %v1780_v47 = vsub.f32 %v7669_v31, %v7688_v57 }
 0x22a   :  { %v1781_v54 = vsub.f32 %v7678_v19, %v7688_v57  ;;  %v1782_v28 = vsub.f32 %v7675_v40, %v7688_v57  ;;  %v1783_v29 = vsub.f32 %v7684_v22, %v7688_v57  ;;  %v1784_v38 = vsub.f32 %v7681_v45, %v7688_v57 }
 0x22b   :  { %v1785_v6 = vmul.f32 %v1769_v58, %v1769_v58  ;;  %v1786_v39 = vmul.f32 %v1770_v0, %v1770_v0  ;;  %v1787_v11 = vmul.f32 %v1771_v2, %v1771_v2  ;;  %v1788_v12 = vmul.f32 %v1772_v8, %v1772_v8 }
 0x22c   :  { %v1789_v49 = vmul.f32 %v1773_v9, %v1773_v9  ;;  %v1790_v59 = vmul.f32 %v1774_v15, %v1774_v15  ;;  %v1791_v63 = vmul.f32 %v1775_v23, %v1775_v23  ;;  %v1792_v4 = vmul.f32 %v1776_v24, %v1776_v24 }
 0x22d   :  { %v1801_v44 = vadd.f32 %v1786_v39, %v1785_v6  ;;  %v1793_v10 = vmul.f32 %v1777_v32, %v1777_v32  ;;  %v1794_v35 = vmul.f32 %v1778_v37, %v1778_v37  ;;  %v1795_v18 = vmul.f32 %v1779_v46, %v1779_v46  ;;  %v1964_v39 = vld [vmem:[%s8566_s4 + $0x18] sm:$0xff] }
 0x22e   :  { %v1796_v20 = vmul.f32 %v1780_v47, %v1780_v47  ;;  %v1797_v25 = vmul.f32 %v1781_v54, %v1781_v54  ;;  %v1798_v55 = vmul.f32 %v1782_v28, %v1782_v28  ;;  %v1799_v60 = vmul.f32 %v1783_v29, %v1783_v29  ;;  %v1744_v54 = vld [vmem:[%s8567_s2] sm:$0x1] }
 0x22f   :  { %v1802_v16 = vadd.f32 %v1801_v44, %v1787_v11  ;;  %v1800_v1 = vmul.f32 %v1784_v38, %v1784_v38  ;;  %v1829_v46 = vlaneseq  ;;  %v1963_v38 = vld [vmem:[%s8566_s4 + $0x10] sm:$0xff]  ;;  %v1965_v11 = vld [vmem:[%s8566_s4 + $0x20] sm:$0xff]  ;;  %v1966_v44 = vld [vmem:[%s8566_s4 + $0x28] sm:$0xff] }
 0x231   :  { %v1803_v52 = vadd.f32 %v1802_v16, %v1788_v12  ;;  %v1830_v47 = vshrl.u32 %v1829_v46, 7  ;;  %v1745_v12 = vld [vmem:[%s8568_s3] sm:$0x1] }
 0x233   :  { %v1804_v27 = vadd.f32 %v1803_v52, %v1789_v49  ;;  %v7725_v28 = vsub.s32 0, %v1830_v47  ;;  %v7746_v52 = vpack.c.bf16 %v1964_v39, %v1963_v38 }
 0x235   :  { %v1805_v42 = vadd.f32 %v1804_v27, %v1790_v59  ;;  %v7748_v59 = vpack.c.bf16 %v1966_v44, %v1965_v11  ;;  %v1985_v11 = vld [vmem:[#allocation2 + $0xa1] sm:$0xff] }
 0x237   :  { %v1806_v48 = vadd.f32 %v1805_v42, %v1791_v63 }
 0x239   :  { %v1807_v13 = vadd.f32 %v1806_v48, %v1792_v4 }
 0x23b   :  { %v1808_v36 = vadd.f32 %v1807_v13, %v1793_v10 }
 0x23d   :  { %v1809_v41 = vadd.f32 %v1808_v36, %v1794_v35 }
 0x23f   :  { %v1810_v50 = vadd.f32 %v1809_v41, %v1795_v18 }
 0x241   :  { %v1811_v51 = vadd.f32 %v1810_v50, %v1796_v20 }
 0x243   :  { %v1812_v56 = vadd.f32 %v1811_v51, %v1797_v25 }
 0x245   :  { %v1813_v61 = vadd.f32 %v1812_v56, %v1798_v55 }
 0x247   :  { %v1814_v58 = vadd.f32 %v1813_v61, %v1799_v60 }
 0x249   :  { %v1815_v0 = vadd.f32 %v1814_v58, %v1800_v1 }
 0x24b   :  { %v1816_v2 = vrot.slane %v1815_v0, 4 }
 0x24d   :  { %v1817_v8 = vadd.f32 %v1816_v2, %v1815_v0 }
 0x24f   :  { %v1818_v9 = vrot.slane %v1817_v8, 2 }
 0x251   :  { %v1819_v15 = vadd.f32 %v1818_v9, %v1817_v8 }
 0x253   :  { %v1820_v23 = vrot.slane %v1819_v15, 1 }
 0x255   :  { %v1821_v24 = vadd.f32 %v1820_v23, %v1819_v15 }
 0x257   :  { %v1822_v32 = vmul.f32 0.0078125, %v1821_v24  ;;  %v1967_v24 = vld [vmem:[%s8566_s4 + $0x30] sm:$0xff] }
 0x259   :  { %v1823_v37 = vadd.f32 1e-05, %v1822_v32  ;;  %v1968_v32 = vld [vmem:[%s8566_s4 + $0x38] sm:$0xff] }
 0x25b   :  { %6591 = vrsqrt.f32 %v1823_v37 }
 0x265   :  { %v6592_v29 = vpop.eup %6591 }
 0x266   :  { %v1825_v6 = vmul.f32 %v6592_v29, %v1744_v54  ;;  %v6090_v29 = vpack.c.bf16 %v1968_v32, %v1967_v24  ;;  %v4075_v24 = vld [vmem:[%s8566_s4 + $0x168] sm:$0xff] }
 0x268   :  { %v1826_v16 = vmul.f32 %v1825_v6, %v7688_v57  ;;  %v7744_v49 = vrot.slane %v1825_v6, %v7725_v28  ;;  %v1969_v6 = vld [vmem:[%s8566_s4 + $0x40] sm:$0xff] }
 0x26a   :  { %v1827_v27 = vsub.f32 %v1745_v12, %v1826_v16  ;;  %v1848_v63 = vmul.f32 %v7744_v49, %v7684_v22  ;;  %v1834_v42 = vmul.f32 %v7744_v49, %v7642_v53  ;;  %v1835_v4 = vmul.f32 %v7640_v21, %v7744_v49  ;;  %v1971_v12 = vld [vmem:[%s8566_s4 + $0x50] sm:$0xff]  ;;  %v1972_v16 = vld [vmem:[%s8566_s4 + $0x58] sm:$0xff] }
 0x26b   :  { %v1836_v57 = vmul.f32 %v7744_v49, %v7648_v62  ;;  %v1837_v48 = vmul.f32 %v7646_v26, %v7744_v49  ;;  %v1838_v10 = vmul.f32 %v7744_v49, %v7654_v34  ;;  %v1839_v13 = vmul.f32 %v7651_v33, %v7744_v49 }
 0x26c   :  { %v7765_v22 = vrot.slane %v1827_v27, %v7725_v28  ;;  %v1840_v53 = vmul.f32 %v7744_v49, %v7660_v43  ;;  %v1842_v21 = vmul.f32 %v7744_v49, %v7666_v30  ;;  %v1843_v62 = vmul.f32 %v7663_v5, %v7744_v49 }
 0x26d   :  { %v1844_v26 = vmul.f32 %v7744_v49, %v7672_v14  ;;  %v1845_v34 = vmul.f32 %v7669_v31, %v7744_v49  ;;  %v1846_v33 = vmul.f32 %v7744_v49, %v7678_v19  ;;  %v1847_v35 = vmul.f32 %v7675_v40, %v7744_v49 }
 0x26e   :  { %v1870_v43 = vadd.f32 %v7765_v22, %v1848_v63  ;;  %v1856_v36 = vadd.f32 %v7765_v22, %v1834_v42  ;;  %v1857_v30 = vadd.f32 %v7765_v22, %v1835_v4  ;;  %v1858_v5 = vadd.f32 %v7765_v22, %v1836_v57  ;;  %v1975_v63 = vld [vmem:[%s8566_s4 + $0x70] sm:$0xff]  ;;  %v1976_v42 = vld [vmem:[%s8566_s4 + $0x78] sm:$0xff]  ;;  %v4062_v57 = vld [vmem:[%s8566_s4 + $0x100] sm:$0xff] }
 0x26f   :  { %v1859_v18 = vadd.f32 %v7765_v22, %v1837_v48  ;;  %v1860_v14 = vadd.f32 %v7765_v22, %v1838_v10  ;;  %v1861_v31 = vadd.f32 %v7765_v22, %v1839_v13  ;;  %v1862_v41 = vadd.f32 %v7765_v22, %v1840_v53  ;;  %v4063_v48 = vld [vmem:[%s8566_s4 + $0x108] sm:$0xff]  ;;  %v4064_v13 = vld [vmem:[%s8566_s4 + $0x110] sm:$0xff] }
 0x270   :  { %v7789_v19 = vmax.f32 %v1870_v43, 0.0  ;;  %v7791_v20 = vmax.f32 %v1856_v36, 0.0  ;;  %v7793_v40 = vmax.f32 %v1857_v30, 0.0  ;;  %v7795_v50 = vmax.f32 %v1858_v5, 0.0  ;;  %v4068_v43 = vld [vmem:[%s8566_s4 + $0x130] sm:$0xff]  ;;  %v4069_v36 = vld [vmem:[%s8566_s4 + $0x138] sm:$0xff] }
 0x271   :  { %v7797_v25 = vmax.f32 %v1859_v18, 0.0  ;;  %v7799_v51 = vmax.f32 %v1860_v14, 0.0  ;;  %v7801_v55 = vmax.f32 %v1861_v31, 0.0  ;;  %v7803_v56 = vmax.f32 %v1862_v41, 0.0  ;;  %v4070_v14 = vld [vmem:[%s8566_s4 + $0x140] sm:$0xff]  ;;  %v4071_v31 = vld [vmem:[%s8566_s4 + $0x148] sm:$0xff] }
 0x272   :  { %1943 = vst [vmem:[#allocation2 + $0x111] sm:$0xff] %v7789_v19  ;;  %1929 = vst [vmem:[#allocation2 + $0x11] sm:$0xff] %v7791_v20  ;;  %5287 = vmatmul.mubr.f32.vlgmr.msra.gmra.mrb[0].mxu1 %v7791_v20  ;;  %v1864_v60 = vadd.f32 %v7765_v22, %v1842_v21  ;;  %v1865_v61 = vadd.f32 %v7765_v22, %v1843_v62  ;;  %v1866_v1 = vadd.f32 %v7765_v22, %v1844_v26  ;;  %v4066_v62 = vld [vmem:[%s8566_s4 + $0x120] sm:$0xff]  ;;  %v4067_v26 = vld [vmem:[%s8566_s4 + $0x128] sm:$0xff] }
 0x273   :  { %1930 = vst [vmem:[#allocation2 + $0x21] sm:$0xff] %v7793_v40  ;;  %1931 = vst [vmem:[#allocation2 + $0x31] sm:$0xff] %v7795_v50  ;;  %v1867_v58 = vadd.f32 %v7765_v22, %v1845_v34  ;;  %5289 = vmatprep.mubr.f32.mxu1 %v7793_v40  ;;  %6081 = vmatpush3.bf16.msra.mxu1 %v7637_v17  ;;  %v1868_v0 = vadd.f32 %v7765_v22, %v1846_v33 }
 0x274   :  { %1932 = vst [vmem:[#allocation2 + $0x41] sm:$0xff] %v7797_v25  ;;  %1933 = vst [vmem:[#allocation2 + $0x51] sm:$0xff] %v7799_v51  ;;  %v1869_v2 = vadd.f32 %v7765_v22, %v1847_v35  ;;  %v1841_v8 = vmul.f32 %v7657_v3, %v7744_v49  ;;  %6083 = vmatprep.subr.bf16.mxu1 %v7746_v52  ;;  %v7825_v9 = vmax.f32 %v1864_v60, 0.0  ;;  %v7827_v17 = vmax.f32 %v1865_v61, 0.0 }
 0x275   :  { %1934 = vst [vmem:[#allocation2 + $0x61] sm:$0xff] %v7801_v55  ;;  %1935 = vst [vmem:[#allocation2 + $0x71] sm:$0xff] %v7803_v56  ;;  %v7829_v15 = vmax.f32 %v1866_v1, 0.0  ;;  %v7831_v23 = vmax.f32 %v1867_v58, 0.0  ;;  %v7839_v37 = vmax.f32 %v1868_v0, 0.0  ;;  %v1849_v47 = vmul.f32 %v7681_v45, %v7744_v49  ;;  %v1970_v45 = vld [vmem:[%s8566_s4 + $0x48] sm:$0xff] }
 0x276   :  { %v7841_v3 = vmax.f32 %v1869_v2, 0.0  ;;  %v1863_v46 = vadd.f32 %v7765_v22, %v1841_v8  ;;  %5290 = vmatmul.mubr.f32.gmra.mrb[2].mxu1 %v7795_v50  ;;  %1937 = vst [vmem:[#allocation2 + $0xb1] sm:$0xff] %v7825_v9  ;;  %1938 = vst [vmem:[#allocation2 + $0xc1] sm:$0xff] %v7827_v17  ;;  %v6094_v44 = vpack.c.bf16 %v1970_v45, %v1969_v6  ;;  %v4072_v1 = vld [vmem:[%s8566_s4 + $0x150] sm:$0xff]  ;;  %v4073_v58 = vld [vmem:[%s8566_s4 + $0x158] sm:$0xff] }
 0x277   :  { %1939 = vst [vmem:[#allocation2 + $0xd1] sm:$0xff] %v7829_v15  ;;  %1940 = vst [vmem:[#allocation2 + $0xe1] sm:$0xff] %v7831_v23  ;;  %5292 = vmatprep.mubr.f32.mxu1 %v7797_v25  ;;  %6085 = vmatpush3.bf16.msra.mxu1 %v7746_v52  ;;  %v1871_v38 = vadd.f32 %v7765_v22, %v1849_v47  ;;  %v6098_v49 = vpack.c.bf16 %v1972_v16, %v1971_v12  ;;  %v1973_v52 = vld [vmem:[%s8566_s4 + $0x60] sm:$0xff]  ;;  %v4065_v22 = vld [vmem:[%s8566_s4 + $0x118] sm:$0xff] }
 0x278   :  { %1941 = vst [vmem:[#allocation2 + $0xf1] sm:$0xff] %v7839_v37  ;;  %1942 = vst [vmem:[#allocation2 + $0x101] sm:$0xff] %v7841_v3  ;;  %v7855_v54 = vmax.f32 %v1863_v46, 0.0  ;;  %6087 = vmatprep.subr.bf16.mxu1 %v7748_v59  ;;  %v6106_v4 = vpack.c.bf16 %v1976_v42, %v1975_v63  ;;  %v6110_v10 = vpack.c.bf16 %v4063_v48, %v4062_v57  ;;  %v4074_v8 = vld [vmem:[%s8566_s4 + $0x160] sm:$0xff]  ;;  %v4076_v47 = vld [vmem:[%s8566_s4 + $0x170] sm:$0xff] }
 0x279   :  { %v7867_v39 = vmax.f32 %v1871_v38, 0.0  ;;  %v6114_v53 = vpack.c.bf16 %v4065_v22, %v4064_v13  ;;  %v7911_v21 = vld [vmem:[#allocation2 + $0x10] sm:$0xff]  ;;  %v6118_v33 = vpack.c.bf16 %v4067_v26, %v4066_v62  ;;  %v6122_v5 = vpack.c.bf16 %v4069_v36, %v4068_v43  ;;  %v2300_v16 = vld [vmem:[#allocation2 + $0x2] sm:$0xff] }
 0x27a   :  { %1936 = vst [vmem:[#allocation2 + $0x81] sm:$0xff] %v7855_v54  ;;  %5293 = vmatmul.mubr.f32.gmra.mrb[4].mxu1 %v7799_v51  ;;  %v7920_v34 = vld [vmem:[#allocation2 + $0x20] sm:$0xff]  ;;  %v7923_v35 = vld [vmem:[#allocation2 + $0x30] sm:$0xff]  ;;  %v6126_v60 = vpack.c.bf16 %v4071_v31, %v4070_v14  ;;  %v6130_v0 = vpack.c.bf16 %v4073_v58, %v4072_v1  ;;  %v4083_v57 = vld [vmem:[%s8566_s4 + $0x1a8] sm:$0xff] }
 0x27b   :  { %5295 = vmatprep.mubr.f32.mxu1 %v7801_v55  ;;  %6089 = vmatpush3.bf16.msra.mxu1 %v7748_v59  ;;  %1944 = vst [vmem:[#allocation2 + $0x121] sm:$0xff] %v7867_v39  ;;  %v1974_v59 = vld [vmem:[%s8566_s4 + $0x68] sm:$0xff]  ;;  %v7932_v30 = vld [vmem:[#allocation2 + $0x40] sm:$0xff]  ;;  %v7935_v18 = vld [vmem:[#allocation2 + $0x50] sm:$0xff] }
 0x27c   :  { %6091 = vmatprep.subr.bf16.mxu1 %v6090_v29  ;;  %v6102_v27 = vpack.c.bf16 %v1974_v59, %v1973_v52  ;;  %v7944_v41 = vld [vmem:[#allocation2 + $0x60] sm:$0xff]  ;;  %v7947_v61 = vld [vmem:[#allocation2 + $0x70] sm:$0xff]  ;;  %v4087_v36 = vld [vmem:[%s8566_s4 + $0x1c8] sm:$0xff] }
 0x27d   :  { %v7957_v2 = vld [vmem:[#allocation2 + $0xb0] sm:$0xff]  ;;  %v7966_v32 = vld [vmem:[#allocation2 + $0xc0] sm:$0xff]  ;;  %v4089_v58 = vld [vmem:[%s8566_s4 + $0x1d8] sm:$0xff] }
 0x27e   :  { %5296 = vmatmul.mubr.f32.gmra.mrb[6].mxu1 %v7803_v56  ;;  %v7969_v46 = vld [vmem:[#allocation2 + $0xd0] sm:$0xff]  ;;  %v7978_v38 = vld [vmem:[#allocation2 + $0xe0] sm:$0xff] }
 0x27f   :  { %6093 = vmatpush3.bf16.msra.mxu1 %v6090_v29  ;;  %5298 = vmatprep.mubr.f32.mxu1 %v1985_v11  ;;  %v4077_v29 = vld [vmem:[%s8566_s4 + $0x178] sm:$0xff]  ;;  %v7981_v45 = vld [vmem:[#allocation2 + $0xf0] sm:$0xff]  ;;  %v4078_v11 = vld [vmem:[%s8566_s4 + $0x180] sm:$0xff] }
 0x280   :  { %6095 = vmatprep.subr.bf16.mxu1 %v6094_v44  ;;  %v6138_v6 = vpack.c.bf16 %v4077_v29, %v4076_v47  ;;  %v7990_v12 = vld [vmem:[#allocation2 + $0x100] sm:$0xff]  ;;  %v7993_v52 = vld [vmem:[#allocation2 + $0x110] sm:$0xff] }
 0x281   :  { %v4080_v59 = vld [vmem:[%s8566_s4 + $0x190] sm:$0xff]  ;;  %v8011_v48 = vld [vmem:[#allocation2 + $0x22] sm:$0xff] }
 0x282   :  { %5299 = vmatmul.mubr.f32.gmra.mrb[8].mxu1 %v7825_v9  ;;  %v8002_v42 = vld [vmem:[#allocation2 + $0x12] sm:$0xff]  ;;  %v8023_v62 = vld [vmem:[#allocation2 + $0x42] sm:$0xff] }
 0x283   :  { %5301 = vmatprep.mubr.f32.mxu1 %v7827_v17  ;;  %6097 = vmatpush3.bf16.msra.mxu1 %v6094_v44  ;;  %v4079_v44 = vld [vmem:[%s8566_s4 + $0x188] sm:$0xff]  ;;  %v8014_v13 = vld [vmem:[#allocation2 + $0x32] sm:$0xff]  ;;  %v4086_v43 = vld [vmem:[%s8566_s4 + $0x1c0] sm:$0xff] }
 0x284   :  { %6099 = vmatprep.subr.bf16.mxu1 %v6098_v49  ;;  %v4084_v22 = vld [vmem:[%s8566_s4 + $0x1b0] sm:$0xff]  ;;  %v2308_v14 = vld [vmem:[#allocation2 + $0xa2] sm:$0xff]  ;;  %v6158_v31 = vpack.c.bf16 %v4087_v36, %v4086_v43 }
 0x285   :  { %v4088_v1 = vld [vmem:[%s8566_s4 + $0x1d0] sm:$0xff]  ;;  %v8056_v47 = vld [vmem:[#allocation2 + $0xc2] sm:$0xff] }
 0x286   :  { %5302 = vmatmul.mubr.f32.gmra.mrb[10].mxu1 %v7829_v15  ;;  %v4098_v43 = vld [vmem:[%s8566_s4 + $0x220] sm:$0xff]  ;;  %v4099_v36 = vld [vmem:[%s8566_s4 + $0x228] sm:$0xff] }
 0x287   :  { %5304 = vmatprep.mubr.f32.mxu1 %v7831_v23  ;;  %6101 = vmatpush3.bf16.msra.mxu1 %v6098_v49  ;;  %v6142_v49 = vpack.c.bf16 %v4079_v44, %v4078_v11  ;;  %v4092_v11 = vld [vmem:[%s8566_s4 + $0x1f0] sm:$0xff]  ;;  %v4093_v44 = vld [vmem:[%s8566_s4 + $0x1f8] sm:$0xff] }
 0x288   :  { %6103 = vmatprep.subr.bf16.mxu1 %v6102_v27 }
 0x28a   :  { %5305 = vmatmul.mubr.f32.gmra.mrb[12].mxu1 %v7839_v37 }
 0x28b   :  { %5307 = vmatprep.mubr.f32.mxu1 %v7841_v3  ;;  %6105 = vmatpush3.bf16.msra.mxu1 %v6102_v27  ;;  %v4081_v27 = vld [vmem:[%s8566_s4 + $0x198] sm:$0xff] }
 0x28c   :  { %6107 = vmatprep.subr.bf16.mxu1 %v6106_v4  ;;  %v6146_v63 = vpack.c.bf16 %v4081_v27, %v4080_v59  ;;  %v8071_v59 = vld [vmem:[#allocation2 + $0xf2] sm:$0xff]  ;;  %v4094_v27 = vld [vmem:[%s8566_s4 + $0x200] sm:$0xff] }
 0x28e   :  { %5308 = vmatmul.mubr.f32.gmra.mrb[14].mxu1 %v7789_v19 }
 0x28f   :  { %6109 = vmatpush3.bf16.msra.mxu1 %v6106_v4  ;;  %5342 = vmatprep.mubr.f32.mxu1 %v6596_v7  ;;  %v4082_v4 = vld [vmem:[%s8566_s4 + $0x1a0] sm:$0xff] }
 0x290   :  { %6111 = vmatprep.subr.bf16.mxu1 %v6110_v10 }
 0x292   :  { %5343 = vmatmul.mubr.f32.vlgmr.msra.gmra.mrb[0].mxu1 %v7911_v21 }
 0x293   :  { %5345 = vmatprep.mubr.f32.mxu1 %v7920_v34  ;;  %6113 = vmatpush3.bf16.msra.mxu1 %v6110_v10  ;;  %v6150_v10 = vpack.c.bf16 %v4083_v57, %v4082_v4  ;;  %v8080_v4 = vld [vmem:[#allocation2 + $0x102] sm:$0xff] }
 0x294   :  { %6115 = vmatprep.subr.bf16.mxu1 %v6114_v53 }
 0x296   :  { %5346 = vmatmul.mubr.f32.gmra.mrb[2].mxu1 %v7923_v35 }
 0x297   :  { %5348 = vmatprep.mubr.f32.mxu1 %v7932_v30  ;;  %6117 = vmatpush3.bf16.msra.mxu1 %v6114_v53  ;;  %v4085_v53 = vld [vmem:[%s8566_s4 + $0x1b8] sm:$0xff] }
 0x298   :  { %6119 = vmatprep.subr.bf16.mxu1 %v6118_v33  ;;  %v6154_v26 = vpack.c.bf16 %v4085_v53, %v4084_v22  ;;  %v4096_v22 = vld [vmem:[%s8566_s4 + $0x210] sm:$0xff]  ;;  %v4097_v53 = vld [vmem:[%s8566_s4 + $0x218] sm:$0xff] }
 0x29a   :  { %5349 = vmatmul.mubr.f32.gmra.mrb[4].mxu1 %v7935_v18 }
 0x29b   :  { %5351 = vmatprep.mubr.f32.mxu1 %v7944_v41  ;;  %6121 = vmatpush3.bf16.msra.mxu1 %v6118_v33  ;;  %v8026_v33 = vld [vmem:[#allocation2 + $0x52] sm:$0xff] }
 0x29c   :  { %6123 = vmatprep.subr.bf16.mxu1 %v6122_v5 }
 0x29e   :  { %5352 = vmatmul.mubr.f32.gmra.mrb[6].mxu1 %v7947_v61 }
 0x29f   :  { %6125 = vmatpush3.bf16.msra.mxu1 %v6122_v5  ;;  %5354 = vmatprep.mubr.f32.mxu1 %v6596_v7  ;;  %v6134_v7 = vpack.c.bf16 %v4075_v24, %v4074_v8  ;;  %v8035_v5 = vld [vmem:[#allocation2 + $0x62] sm:$0xff]  ;;  %v8047_v8 = vld [vmem:[#allocation2 + $0xb2] sm:$0xff] }
 0x2a0   :  { %6127 = vmatprep.subr.bf16.mxu1 %v6126_v60  ;;  %v4090_v24 = vld [vmem:[%s8566_s4 + $0x1e0] sm:$0xff] }
 0x2a2   :  { %5355 = vmatmul.mubr.f32.gmra.mrb[8].mxu1 %v7957_v2 }
 0x2a3   :  { %5357 = vmatprep.mubr.f32.mxu1 %v7966_v32  ;;  %6129 = vmatpush3.bf16.msra.mxu1 %v6126_v60  ;;  %v8038_v60 = vld [vmem:[#allocation2 + $0x72] sm:$0xff] }
 0x2a4   :  { %6131 = vmatprep.subr.bf16.mxu1 %v6130_v0 }
 0x2a6   :  { %5358 = vmatmul.mubr.f32.gmra.mrb[10].mxu1 %v7969_v46 }
 0x2a7   :  { %5360 = vmatprep.mubr.f32.mxu1 %v7978_v38  ;;  %6133 = vmatpush3.bf16.msra.mxu1 %v6130_v0  ;;  %v6162_v0 = vpack.c.bf16 %v4089_v58, %v4088_v1  ;;  %v4102_v58 = vld [vmem:[%s8566_s4 + $0x240] sm:$0xff] }
 0x2a8   :  { %6135 = vmatprep.subr.bf16.mxu1 %v6134_v7 }
 0x2aa   :  { %5361 = vmatmul.mubr.f32.gmra.mrb[12].mxu1 %v7981_v45 }
 0x2ab   :  { %5363 = vmatprep.mubr.f32.mxu1 %v7990_v12  ;;  %6137 = vmatpush3.bf16.msra.mxu1 %v6134_v7  ;;  %v4091_v7 = vld [vmem:[%s8566_s4 + $0x1e8] sm:$0xff] }
 0x2ac   :  { %6139 = vmatprep.subr.bf16.mxu1 %v6138_v6  ;;  %v6166_v29 = vpack.c.bf16 %v4091_v7, %v4090_v24  ;;  %v8117_v7 = vld [vmem:[#allocation2 + $0x80] sm:$0xff] }
 0x2ae   :  { %5364 = vmatmul.mubr.f32.gmra.mrb[14].mxu1 %v7993_v52 }
 0x2af   :  { %6141 = vmatpush3.bf16.msra.mxu1 %v6138_v6  ;;  %5398 = vmatprep.mubr.f32.mxu1 %v2300_v16  ;;  %v8059_v6 = vld [vmem:[#allocation2 + $0xd2] sm:$0xff]  ;;  %v8068_v16 = vld [vmem:[#allocation2 + $0xe2] sm:$0xff] }
 0x2b0   :  { %6143 = vmatprep.subr.bf16.mxu1 %v6142_v49 }
 0x2b2   :  { %5399 = vmatmul.mubr.f32.vlgmr.msra.gmra.mrb[0].mxu1 %v8002_v42 }
 0x2b3   :  { %5401 = vmatprep.mubr.f32.mxu1 %v8011_v48  ;;  %6145 = vmatpush3.bf16.msra.mxu1 %v6142_v49  ;;  %v6170_v49 = vpack.c.bf16 %v4093_v44, %v4092_v11  ;;  %v4105_v11 = vld [vmem:[%s8566_s4 + $0x258] sm:$0xff] }
 0x2b4   :  { %6147 = vmatprep.subr.bf16.mxu1 %v6146_v63 }
 0x2b6   :  { %5402 = vmatmul.mubr.f32.gmra.mrb[2].mxu1 %v8014_v13 }
 0x2b7   :  { %5404 = vmatprep.mubr.f32.mxu1 %v8023_v62  ;;  %6149 = vmatpush3.bf16.msra.mxu1 %v6146_v63  ;;  %v4095_v63 = vld [vmem:[%s8566_s4 + $0x208] sm:$0xff] }
 0x2b8   :  { %6151 = vmatprep.subr.bf16.mxu1 %v6150_v10  ;;  %v6174_v57 = vpack.c.bf16 %v4095_v63, %v4094_v27  ;;  %v4107_v27 = vld [vmem:[%s8566_s4 + $0x268] sm:$0xff] }
 0x2ba   :  { %5405 = vmatmul.mubr.f32.gmra.mrb[4].mxu1 %v8026_v33 }
 0x2bb   :  { %5407 = vmatprep.mubr.f32.mxu1 %v8035_v5  ;;  %6153 = vmatpush3.bf16.msra.mxu1 %v6150_v10  ;;  %v8083_v10 = vld [vmem:[#allocation2 + $0x112] sm:$0xff] }
 0x2bc   :  { %6155 = vmatprep.subr.bf16.mxu1 %v6154_v26 }
 0x2be   :  { %5408 = vmatmul.mubr.f32.gmra.mrb[6].mxu1 %v8038_v60 }
 0x2bf   :  { %6157 = vmatpush3.bf16.msra.mxu1 %v6154_v26  ;;  %5410 = vmatprep.mubr.f32.mxu1 %v2308_v14  ;;  %v6178_v26 = vpack.c.bf16 %v4097_v53, %v4096_v22  ;;  %v6182_v14 = vpack.c.bf16 %v4099_v36, %v4098_v43  ;;  %v4110_v53 = vld [vmem:[%s8566_s4 + $0x280] sm:$0xff] }
 0x2c0   :  { %6159 = vmatprep.subr.bf16.mxu1 %v6158_v31  ;;  %v8151_v36 = vld [vmem:[#allocation2 + $0x120] sm:$0xff] }
 0x2c2   :  { %5411 = vmatmul.mubr.f32.gmra.mrb[8].mxu1 %v8047_v8 }
 0x2c3   :  { %5413 = vmatprep.mubr.f32.mxu1 %v8056_v47  ;;  %6161 = vmatpush3.bf16.msra.mxu1 %v6158_v31  ;;  %v4101_v31 = vld [vmem:[%s8566_s4 + $0x238] sm:$0xff] }
 0x2c4   :  { %6163 = vmatprep.subr.bf16.mxu1 %v6162_v0 }
 0x2c6   :  { %5414 = vmatmul.mubr.f32.gmra.mrb[10].mxu1 %v8059_v6 }
 0x2c7   :  { %5416 = vmatprep.mubr.f32.mxu1 %v8068_v16  ;;  %6165 = vmatpush3.bf16.msra.mxu1 %v6162_v0  ;;  %v4103_v0 = vld [vmem:[%s8566_s4 + $0x248] sm:$0xff] }
 0x2c8   :  { %6167 = vmatprep.subr.bf16.mxu1 %v6166_v29  ;;  %v6190_v24 = vpack.c.bf16 %v4103_v0, %v4102_v58  ;;  %v4115_v58 = vld [vmem:[%s8566_s4 + $0x2a8] sm:$0xff] }
 0x2ca   :  { %5417 = vmatmul.mubr.f32.gmra.mrb[12].mxu1 %v8071_v59 }
 0x2cb   :  { %5419 = vmatprep.mubr.f32.mxu1 %v8080_v4  ;;  %6169 = vmatpush3.bf16.msra.mxu1 %v6166_v29  ;;  %v4104_v29 = vld [vmem:[%s8566_s4 + $0x250] sm:$0xff] }
 0x2cc   :  { %6171 = vmatprep.subr.bf16.mxu1 %v6170_v49  ;;  %v6194_v44 = vpack.c.bf16 %v4105_v11, %v4104_v29  ;;  %v4119_v29 = vld [vmem:[%s8566_s4 + $0x2c8] sm:$0xff]  ;;  %v4121_v11 = vld [vmem:[%s8566_s4 + $0x2d8] sm:$0xff] }
 0x2ce   :  { %5420 = vmatmul.mubr.f32.gmra.mrb[14].mxu1 %v8083_v10 }
 0x2cf   :  { %6173 = vmatpush3.bf16.msra.mxu1 %v6170_v49  ;;  %5454 = vmatprep.mubr.f32.mxu1 %v7911_v21  ;;  %v4100_v21 = vld [vmem:[%s8566_s4 + $0x230] sm:$0xff]  ;;  %v4106_v49 = vld [vmem:[%s8566_s4 + $0x260] sm:$0xff] }
 0x2d0   :  { %6175 = vmatprep.subr.bf16.mxu1 %v6174_v57  ;;  %v6186_v1 = vpack.c.bf16 %v4101_v31, %v4100_v21  ;;  %v6198_v63 = vpack.c.bf16 %v4107_v27, %v4106_v49  ;;  %v4113_v21 = vld [vmem:[%s8566_s4 + $0x298] sm:$0xff] }
 0x2d1   :  { %v4125_v27 = vld [vmem:[%s8566_s4 + $0x2f8] sm:$0xff] }
 0x2d2   :  { %5455 = vmatmul.mubr.f32.vlgmr.msra.gmra.mrb[0].mxu1 %v7920_v34 }
 0x2d3   :  { %5457 = vmatprep.mubr.f32.mxu1 %v7923_v35  ;;  %6177 = vmatpush3.bf16.msra.mxu1 %v6174_v57  ;;  %v4109_v57 = vld [vmem:[%s8566_s4 + $0x278] sm:$0xff] }
 0x2d4   :  { %6179 = vmatprep.subr.bf16.mxu1 %v6178_v26 }
 0x2d6   :  { %5458 = vmatmul.mubr.f32.gmra.mrb[2].mxu1 %v7932_v30 }
 0x2d7   :  { %5460 = vmatprep.mubr.f32.mxu1 %v7935_v18  ;;  %6181 = vmatpush3.bf16.msra.mxu1 %v6178_v26  ;;  %v4111_v26 = vld [vmem:[%s8566_s4 + $0x288] sm:$0xff] }
 0x2d8   :  { %6183 = vmatprep.subr.bf16.mxu1 %v6182_v14  ;;  %v6206_v43 = vpack.c.bf16 %v4111_v26, %v4110_v53  ;;  %v4131_v26 = vld [vmem:[%s8566_s4 + $0x328] sm:$0xff] }
 0x2da   :  { %5461 = vmatmul.mubr.f32.gmra.mrb[4].mxu1 %v7944_v41 }
 0x2db   :  { %5463 = vmatprep.mubr.f32.mxu1 %v7947_v61  ;;  %6185 = vmatpush3.bf16.msra.mxu1 %v6182_v14  ;;  %v4112_v14 = vld [vmem:[%s8566_s4 + $0x290] sm:$0xff] }
 0x2dc   :  { %6187 = vmatprep.subr.bf16.mxu1 %v6186_v1  ;;  %v6210_v31 = vpack.c.bf16 %v4113_v21, %v4112_v14  ;;  %v4133_v14 = vld [vmem:[%s8566_s4 + $0x338] sm:$0xff] }
 0x2de   :  { %5464 = vmatmul.mubr.f32.gmra.mrb[6].mxu1 %v8117_v7 }
 0x2df   :  { %5466 = vmatprep.mubr.f32.mxu1 %v7957_v2  ;;  %6189 = vmatpush3.bf16.msra.mxu1 %v6186_v1  ;;  %v4108_v2 = vld [vmem:[%s8566_s4 + $0x270] sm:$0xff]  ;;  %v4114_v1 = vld [vmem:[%s8566_s4 + $0x2a0] sm:$0xff] }
 0x2e0   :  { %6191 = vmatprep.subr.bf16.mxu1 %v6190_v24  ;;  %v6202_v22 = vpack.c.bf16 %v4109_v57, %v4108_v2  ;;  %v6214_v0 = vpack.c.bf16 %v4115_v58, %v4114_v1  ;;  %v4128_v57 = vld [vmem:[%s8566_s4 + $0x310] sm:$0xff]  ;;  %v4135_v1 = vld [vmem:[%s8566_s4 + $0x348] sm:$0xff] }
 0x2e2   :  { %5467 = vmatmul.mubr.f32.gmra.mrb[8].mxu1 %v7966_v32 }
 0x2e3   :  { %5469 = vmatprep.mubr.f32.mxu1 %v7969_v46  ;;  %6193 = vmatpush3.bf16.msra.mxu1 %v6190_v24  ;;  %v4117_v24 = vld [vmem:[%s8566_s4 + $0x2b8] sm:$0xff] }
 0x2e4   :  { %6195 = vmatprep.subr.bf16.mxu1 %v6194_v44 }
 0x2e6   :  { %5470 = vmatmul.mubr.f32.gmra.mrb[10].mxu1 %v7978_v38 }
 0x2e7   :  { %5472 = vmatprep.mubr.f32.mxu1 %v7981_v45  ;;  %6197 = vmatpush3.bf16.msra.mxu1 %v6194_v44  ;;  %v4123_v44 = vld [vmem:[%s8566_s4 + $0x2e8] sm:$0xff] }
 0x2e8   :  { %6199 = vmatprep.subr.bf16.mxu1 %v6198_v63 }
 0x2ea   :  { %5473 = vmatmul.mubr.f32.gmra.mrb[12].mxu1 %v7990_v12 }
 0x2eb   :  { %5475 = vmatprep.mubr.f32.mxu1 %v7993_v52  ;;  %6201 = vmatpush3.bf16.msra.mxu1 %v6198_v63  ;;  %v4127_v63 = vld [vmem:[%s8566_s4 + $0x308] sm:$0xff] }
 0x2ec   :  { %6203 = vmatprep.subr.bf16.mxu1 %v6202_v22 }
 0x2ee   :  { %5476 = vmatmul.mubr.f32.gmra.mrb[14].mxu1 %v8151_v36 }
 0x2ef   :  { %6205 = vmatpush3.bf16.msra.mxu1 %v6202_v22  ;;  %5510 = vmatprep.mubr.f32.mxu1 %v7791_v20  ;;  %v4116_v20 = vld [vmem:[%s8566_s4 + $0x2b0] sm:$0xff]  ;;  %v4129_v22 = vld [vmem:[%s8566_s4 + $0x318] sm:$0xff] }
 0x2f0   :  { %6207 = vmatprep.subr.bf16.mxu1 %v6206_v43  ;;  %v6242_v53 = vpack.c.bf16 %v4129_v22, %v4128_v57  ;;  %v4149_v57 = vld [vmem:[%s8566_s4 + $0x3b8] sm:$0xff]  ;;  %v4151_v22 = vld [vmem:[%s8566_s4 + $0x3c8] sm:$0xff] }
 0x2f2   :  { %5511 = vmatmul.mubr.f32.vlgmr.msra.gmra.mrb[0].mxu1 %v7793_v40  ;;  %v6218_v40 = vpack.c.bf16 %v4117_v24, %v4116_v20  ;;  %v4136_v20 = vld [vmem:[%s8566_s4 + $0x350] sm:$0xff]  ;;  %v4137_v24 = vld [vmem:[%s8566_s4 + $0x358] sm:$0xff] }
 0x2f3   :  { %5513 = vmatprep.mubr.f32.mxu1 %v7795_v50  ;;  %6209 = vmatpush3.bf16.msra.mxu1 %v6206_v43  ;;  %v4118_v50 = vld [vmem:[%s8566_s4 + $0x2c0] sm:$0xff] }
 0x2f4   :  { %6211 = vmatprep.subr.bf16.mxu1 %v6210_v31 }
 0x2f6   :  { %5514 = vmatmul.mubr.f32.gmra.mrb[2].mxu1 %v7797_v25  ;;  %v6222_v25 = vpack.c.bf16 %v4119_v29, %v4118_v50  ;;  %v4138_v50 = vld [vmem:[%s8566_s4 + $0x360] sm:$0xff]  ;;  %v4139_v29 = vld [vmem:[%s8566_s4 + $0x368] sm:$0xff] }
 0x2f7   :  { %5516 = vmatprep.mubr.f32.mxu1 %v7799_v51  ;;  %6213 = vmatpush3.bf16.msra.mxu1 %v6210_v31  ;;  %v4120_v51 = vld [vmem:[%s8566_s4 + $0x2d0] sm:$0xff]  ;;  %v4134_v31 = vld [vmem:[%s8566_s4 + $0x340] sm:$0xff] }
 0x2f8   :  { %6215 = vmatprep.subr.bf16.mxu1 %v6214_v0  ;;  %v6254_v58 = vpack.c.bf16 %v4135_v1, %v4134_v31  ;;  %v3271_v31 = vld [vmem:[#allocation2 + $0x21] sm:$0xff] }
 0x2fa   :  { %5517 = vmatmul.mubr.f32.gmra.mrb[4].mxu1 %v7801_v55  ;;  %v6226_v55 = vpack.c.bf16 %v4121_v11, %v4120_v51  ;;  %v4141_v51 = vld [vmem:[%s8566_s4 + $0x378] sm:$0xff] }
 0x2fb   :  { %5519 = vmatprep.mubr.f32.mxu1 %v7803_v56  ;;  %6217 = vmatpush3.bf16.msra.mxu1 %v6214_v0  ;;  %v4122_v56 = vld [vmem:[%s8566_s4 + $0x2e0] sm:$0xff] }
 0x2fc   :  { %6219 = vmatprep.subr.bf16.mxu1 %v6218_v40  ;;  %v6230_v49 = vpack.c.bf16 %v4123_v44, %v4122_v56  ;;  %v8249_v0 = vld [vmem:[#allocation2 + $0x82] sm:$0xff] }
 0x2fd   :  { %v4143_v56 = vld [vmem:[%s8566_s4 + $0x388] sm:$0xff] }
 0x2fe   :  { %5520 = vmatmul.mubr.f32.gmra.mrb[6].mxu1 %v7855_v54 }
 0x2ff   :  { %5522 = vmatprep.mubr.f32.mxu1 %v7825_v9  ;;  %6221 = vmatpush3.bf16.msra.mxu1 %v6218_v40  ;;  %v4124_v9 = vld [vmem:[%s8566_s4 + $0x2f0] sm:$0xff]  ;;  %v6258_v40 = vpack.c.bf16 %v4137_v24, %v4136_v20  ;;  %v3273_v20 = vld [vmem:[#allocation2 + $0x41] sm:$0xff] }
 0x300   :  { %6223 = vmatprep.subr.bf16.mxu1 %v6222_v25 }
 0x302   :  { %5523 = vmatmul.mubr.f32.gmra.mrb[8].mxu1 %v7827_v17  ;;  %v6234_v17 = vpack.c.bf16 %v4125_v27, %v4124_v9  ;;  %v4144_v9 = vld [vmem:[%s8566_s4 + $0x390] sm:$0xff]  ;;  %v4145_v27 = vld [vmem:[%s8566_s4 + $0x398] sm:$0xff] }
 0x303   :  { %5525 = vmatprep.mubr.f32.mxu1 %v7829_v15  ;;  %6225 = vmatpush3.bf16.msra.mxu1 %v6222_v25  ;;  %v4126_v15 = vld [vmem:[%s8566_s4 + $0x300] sm:$0xff]  ;;  %v6262_v25 = vpack.c.bf16 %v4139_v29, %v4138_v50  ;;  %v4164_v50 = vld [vmem:[%s8566_s4 + $0x430] sm:$0xff]  ;;  %v4165_v29 = vld [vmem:[%s8566_s4 + $0x438] sm:$0xff] }
 0x304   :  { %6227 = vmatprep.subr.bf16.mxu1 %v6226_v55  ;;  %v6238_v2 = vpack.c.bf16 %v4127_v63, %v4126_v15  ;;  %v4146_v15 = vld [vmem:[%s8566_s4 + $0x3a0] sm:$0xff]  ;;  %v4147_v63 = vld [vmem:[%s8566_s4 + $0x3a8] sm:$0xff] }
 0x306   :  { %5526 = vmatmul.mubr.f32.gmra.mrb[10].mxu1 %v7831_v23 }
 0x307   :  { %5528 = vmatprep.mubr.f32.mxu1 %v7839_v37  ;;  %6229 = vmatpush3.bf16.msra.mxu1 %v6226_v55  ;;  %v4142_v55 = vld [vmem:[%s8566_s4 + $0x380] sm:$0xff] }
 0x308   :  { %6231 = vmatprep.subr.bf16.mxu1 %v6230_v49  ;;  %v6270_v44 = vpack.c.bf16 %v4143_v56, %v4142_v55  ;;  %v4167_v55 = vld [vmem:[%s8566_s4 + $0x448] sm:$0xff]  ;;  %v3278_v56 = vld [vmem:[#allocation2 + $0x91] sm:$0xff] }
 0x30a   :  { %5529 = vmatmul.mubr.f32.gmra.mrb[12].mxu1 %v7841_v3 }
 0x30b   :  { %5531 = vmatprep.mubr.f32.mxu1 %v7789_v19  ;;  %6233 = vmatpush3.bf16.msra.mxu1 %v6230_v49  ;;  %v4130_v19 = vld [vmem:[%s8566_s4 + $0x320] sm:$0xff] }
 0x30c   :  { %6235 = vmatprep.subr.bf16.mxu1 %v6234_v17  ;;  %v6246_v43 = vpack.c.bf16 %v4131_v26, %v4130_v19  ;;  %v8283_v49 = vld [vmem:[#allocation2 + $0x122] sm:$0xff] }
 0x30d   :  { %v6595_v19 = vld [vmem:[#allocation2] sm:$0xff]  ;;  %v4155_v26 = vld [vmem:[%s8566_s4 + $0x3e8] sm:$0xff] }
 0x30e   :  { %5532 = vmatmul.mubr.f32.gmra.mrb[14].mxu1 %v7867_v39 }
 0x30f   :  { %6237 = vmatpush3.bf16.msra.mxu1 %v6234_v17  ;;  %5566 = vmatprep.mubr.f32.mxu1 %v8002_v42  ;;  %v4132_v42 = vld [vmem:[%s8566_s4 + $0x330] sm:$0xff]  ;;  %v6274_v17 = vpack.c.bf16 %v4145_v27, %v4144_v9  ;;  %v4169_v27 = vld [vmem:[%s8566_s4 + $0x458] sm:$0xff] }
 0x310   :  { %6239 = vmatprep.subr.bf16.mxu1 %v6238_v2  ;;  %v6250_v21 = vpack.c.bf16 %v4133_v14, %v4132_v42  ;;  %v4157_v42 = vld [vmem:[%s8566_s4 + $0x3f8] sm:$0xff]  ;;  %v4159_v14 = vld [vmem:[%s8566_s4 + $0x408] sm:$0xff]  ;;  %v4168_v9 = vld [vmem:[%s8566_s4 + $0x450] sm:$0xff] }
 0x312   :  { %5567 = vmatmul.mubr.f32.vlgmr.msra.gmra.mrb[0].mxu1 %v8011_v48 }
 0x313   :  { %5569 = vmatprep.mubr.f32.mxu1 %v8014_v13  ;;  %6241 = vmatpush3.bf16.msra.mxu1 %v6238_v2  ;;  %v6278_v2 = vpack.c.bf16 %v4147_v63, %v4146_v15  ;;  %v6322_v15 = vpack.c.bf16 %v4169_v27, %v4168_v9  ;;  %v3280_v63 = vld [vmem:[#allocation2 + $0xd1] sm:$0xff] }
 0x314   :  { %6243 = vmatprep.subr.bf16.mxu1 %v6242_v53 }
 0x316   :  { %5570 = vmatmul.mubr.f32.gmra.mrb[2].mxu1 %v8023_v62 }
 0x317   :  { %5572 = vmatprep.mubr.f32.mxu1 %v8026_v33  ;;  %6245 = vmatpush3.bf16.msra.mxu1 %v6242_v53  ;;  %v4153_v53 = vld [vmem:[%s8566_s4 + $0x3d8] sm:$0xff] }
 0x318   :  { %6247 = vmatprep.subr.bf16.mxu1 %v6246_v43 }
 0x31a   :  { %5573 = vmatmul.mubr.f32.gmra.mrb[4].mxu1 %v8035_v5 }
 0x31b   :  { %5575 = vmatprep.mubr.f32.mxu1 %v8038_v60  ;;  %6249 = vmatpush3.bf16.msra.mxu1 %v6246_v43 }
 0x31c   :  { %6251 = vmatprep.subr.bf16.mxu1 %v6250_v21 }
 0x31e   :  { %5576 = vmatmul.mubr.f32.gmra.mrb[6].mxu1 %v8249_v0 }
 0x31f   :  { %5578 = vmatprep.mubr.f32.mxu1 %v8047_v8  ;;  %6253 = vmatpush3.bf16.msra.mxu1 %v6250_v21  ;;  %v4140_v8 = vld [vmem:[%s8566_s4 + $0x370] sm:$0xff]  ;;  %v4161_v21 = vld [vmem:[%s8566_s4 + $0x418] sm:$0xff] }
 0x320   :  { %6255 = vmatprep.subr.bf16.mxu1 %v6254_v58  ;;  %v6266_v11 = vpack.c.bf16 %v4141_v51, %v4140_v8  ;;  %v6314_v8 = vpack.c.bf16 %v4165_v29, %v4164_v50  ;;  %v3276_v51 = vld [vmem:[#allocation2 + $0x71] sm:$0xff] }
 0x322   :  { %5579 = vmatmul.mubr.f32.gmra.mrb[8].mxu1 %v8056_v47 }
 0x323   :  { %5581 = vmatprep.mubr.f32.mxu1 %v8059_v6  ;;  %6257 = vmatpush3.bf16.msra.mxu1 %v6254_v58  ;;  %v4163_v58 = vld [vmem:[%s8566_s4 + $0x428] sm:$0xff] }
 0x324   :  { %6259 = vmatprep.subr.bf16.mxu1 %v6258_v40 }
 0x326   :  { %5582 = vmatmul.mubr.f32.gmra.mrb[10].mxu1 %v8068_v16 }
 0x327   :  { %5584 = vmatprep.mubr.f32.mxu1 %v8071_v59  ;;  %6261 = vmatpush3.bf16.msra.mxu1 %v6258_v40  ;;  %v3274_v40 = vld [vmem:[#allocation2 + $0x51] sm:$0xff] }
 0x328   :  { %6263 = vmatprep.subr.bf16.mxu1 %v6262_v25 }
 0x32a   :  { %5585 = vmatmul.mubr.f32.gmra.mrb[12].mxu1 %v8080_v4 }
 0x32b   :  { %5587 = vmatprep.mubr.f32.mxu1 %v8083_v10  ;;  %6265 = vmatpush3.bf16.msra.mxu1 %v6262_v25  ;;  %v3275_v25 = vld [vmem:[#allocation2 + $0x61] sm:$0xff] }
 0x32c   :  { %6267 = vmatprep.subr.bf16.mxu1 %v6266_v11 }
 0x32e   :  { %5588 = vmatmul.mubr.f32.gmra.mrb[14].mxu1 %v8283_v49 }
 0x32f   :  { %6269 = vmatpush3.bf16.msra.mxu1 %v6266_v11  ;;  %5622 = vmatprep.mubr.f32.mxu1 %v7920_v34  ;;  %v4148_v34 = vld [vmem:[%s8566_s4 + $0x3b0] sm:$0xff]  ;;  %v4166_v11 = vld [vmem:[%s8566_s4 + $0x440] sm:$0xff] }
 0x330   :  { %6271 = vmatprep.subr.bf16.mxu1 %v6270_v44 }
 0x332   :  { %5623 = vmatmul.mubr.f32.vlgmr.msra.gmra.mrb[0].mxu1 %v7923_v35  ;;  %v6282_v35 = vpack.c.bf16 %v4149_v57, %v4148_v34  ;;  %v4172_v57 = vld [vmem:[%s8566_s4 + $0x470] sm:$0xff] }
 0x333   :  { %5625 = vmatprep.mubr.f32.mxu1 %v7932_v30  ;;  %6273 = vmatpush3.bf16.msra.mxu1 %v6270_v44  ;;  %v4150_v30 = vld [vmem:[%s8566_s4 + $0x3c0] sm:$0xff]  ;;  %v6318_v44 = vpack.c.bf16 %v4167_v55, %v4166_v11 }
 0x334   :  { %6275 = vmatprep.subr.bf16.mxu1 %v6274_v17 }
 0x336   :  { %5626 = vmatmul.mubr.f32.gmra.mrb[2].mxu1 %v7935_v18  ;;  %v6286_v18 = vpack.c.bf16 %v4151_v22, %v4150_v30  ;;  %v3284_v22 = vld [vmem:[#allocation2 + $0x111] sm:$0xff] }
 0x337   :  { %5628 = vmatprep.mubr.f32.mxu1 %v7944_v41  ;;  %6277 = vmatpush3.bf16.msra.mxu1 %v6274_v17  ;;  %v4152_v41 = vld [vmem:[%s8566_s4 + $0x3d0] sm:$0xff]  ;;  %v3279_v17 = vld [vmem:[#allocation2 + $0xc1] sm:$0xff] }
 0x338   :  { %6279 = vmatprep.subr.bf16.mxu1 %v6278_v2 }
 0x33a   :  { %5629 = vmatmul.mubr.f32.gmra.mrb[4].mxu1 %v7947_v61  ;;  %v6290_v61 = vpack.c.bf16 %v4153_v53, %v4152_v41 }
 0x33b   :  { %5631 = vmatprep.mubr.f32.mxu1 %v8117_v7  ;;  %6281 = vmatpush3.bf16.msra.mxu1 %v6278_v2  ;;  %v4154_v7 = vld [vmem:[%s8566_s4 + $0x3e0] sm:$0xff]  ;;  %v4171_v2 = vld [vmem:[%s8566_s4 + $0x468] sm:$0xff] }
 0x33c   :  { %6283 = vmatprep.subr.bf16.mxu1 %v6282_v35  ;;  %v6294_v43 = vpack.c.bf16 %v4155_v26, %v4154_v7 }
 0x33e   :  { %5632 = vmatmul.mubr.f32.gmra.mrb[6].mxu1 %v6595_v19 }
 0x33f   :  { %5634 = vmatprep.mubr.f32.mxu1 %v7966_v32  ;;  %6285 = vmatpush3.bf16.msra.mxu1 %v6282_v35  ;;  %v4156_v32 = vld [vmem:[%s8566_s4 + $0x3f0] sm:$0xff]  ;;  %v4173_v35 = vld [vmem:[%s8566_s4 + $0x478] sm:$0xff] }
 0x340   :  { %6287 = vmatprep.subr.bf16.mxu1 %v6286_v18  ;;  %v6330_v30 = vpack.c.bf16 %v4173_v35, %v4172_v57 }
 0x342   :  { %5635 = vmatmul.mubr.f32.gmra.mrb[8].mxu1 %v7969_v46  ;;  %v6298_v46 = vpack.c.bf16 %v4157_v42, %v4156_v32 }
 0x343   :  { %5637 = vmatprep.mubr.f32.mxu1 %v7978_v38  ;;  %6289 = vmatpush3.bf16.msra.mxu1 %v6286_v18  ;;  %v4158_v38 = vld [vmem:[%s8566_s4 + $0x400] sm:$0xff] }
 0x344   :  { %6291 = vmatprep.subr.bf16.mxu1 %v6290_v61 }
 0x346   :  { %5638 = vmatmul.mubr.f32.gmra.mrb[10].mxu1 %v7981_v45  ;;  %v6302_v45 = vpack.c.bf16 %v4159_v14, %v4158_v38 }
 0x347   :  { %5640 = vmatprep.mubr.f32.mxu1 %v7990_v12  ;;  %6293 = vmatpush3.bf16.msra.mxu1 %v6290_v61  ;;  %v4160_v12 = vld [vmem:[%s8566_s4 + $0x410] sm:$0xff] }
 0x348   :  { %6295 = vmatprep.subr.bf16.mxu1 %v6294_v43  ;;  %v6306_v1 = vpack.c.bf16 %v4161_v21, %v4160_v12 }
 0x34a   :  { %5641 = vmatmul.mubr.f32.gmra.mrb[12].mxu1 %v7993_v52  ;;  %v3272_v52 = vld [vmem:[#allocation2 + $0x31] sm:$0xff] }
 0x34b   :  { %5643 = vmatprep.mubr.f32.mxu1 %v8151_v36  ;;  %6297 = vmatpush3.bf16.msra.mxu1 %v6294_v43  ;;  %v4162_v36 = vld [vmem:[%s8566_s4 + $0x420] sm:$0xff] }
 0x34c   :  { %6299 = vmatprep.subr.bf16.mxu1 %v6298_v46  ;;  %v6310_v24 = vpack.c.bf16 %v4163_v58, %v4162_v36 }
 0x34e   :  { %5644 = vmatmul.mubr.f32.gmra.mrb[14].mxu1 %v6595_v19 }
 0x34f   :  { %6301 = vmatpush3.bf16.msra.mxu1 %v6298_v46  ;;  %5678 = vmatprep.mubr.f32.mxu1 %v3271_v31 }
 0x350   :  { %6303 = vmatprep.subr.bf16.mxu1 %v6302_v45 }
 0x352   :  { %5679 = vmatmul.mubr.f32.vlgmr.msra.gmra.mrb[0].mxu1 %v3272_v52 }
 0x353   :  { %5681 = vmatprep.mubr.f32.mxu1 %v3273_v20  ;;  %6305 = vmatpush3.bf16.msra.mxu1 %v6302_v45 }
 0x354   :  { %6307 = vmatprep.subr.bf16.mxu1 %v6306_v1 }
 0x356   :  { %5682 = vmatmul.mubr.f32.gmra.mrb[2].mxu1 %v3274_v40 }
 0x357   :  { %5684 = vmatprep.mubr.f32.mxu1 %v3275_v25  ;;  %6309 = vmatpush3.bf16.msra.mxu1 %v6306_v1 }
 0x358   :  { %6311 = vmatprep.subr.bf16.mxu1 %v6310_v24 }
 0x35a   :  { %5685 = vmatmul.mubr.f32.gmra.mrb[4].mxu1 %v3276_v51 }
 0x35b   :  { %5687 = vmatprep.mubr.f32.mxu1 %v7855_v54  ;;  %6313 = vmatpush3.bf16.msra.mxu1 %v6310_v24  ;;  %v4170_v54 = vld [vmem:[%s8566_s4 + $0x460] sm:$0xff] }
 0x35c   :  { %6315 = vmatprep.subr.bf16.mxu1 %v6314_v8  ;;  %v6326_v34 = vpack.c.bf16 %v4171_v2, %v4170_v54 }
 0x35e   :  { %5688 = vmatmul.mubr.f32.gmra.mrb[6].mxu1 %v3278_v56 }
 0x35f   :  { %5690 = vmatprep.mubr.f32.mxu1 %v3279_v17  ;;  %6317 = vmatpush3.bf16.msra.mxu1 %v6314_v8 }
 0x360   :  { %6319 = vmatprep.subr.bf16.mxu1 %v6318_v44 }
 0x362   :  { %5691 = vmatmul.mubr.f32.gmra.mrb[8].mxu1 %v3280_v63 }
 0x363   :  { %5693 = vmatprep.mubr.f32.mxu1 %v7831_v23  ;;  %6321 = vmatpush3.bf16.msra.mxu1 %v6318_v44  ;;  %v3286_v23 = vld [vmem:[#allocation2 + $0x131] sm:$0xff] }
 0x364   :  { %6323 = vmatprep.subr.bf16.mxu1 %v6322_v15 }
 0x366   :  { %5694 = vmatmul.mubr.f32.gmra.mrb[10].mxu1 %v7839_v37  ;;  %v3472_v37 = vld [vmem:[#allocation2 + $0x92] sm:$0xff] }
 0x367   :  { %5696 = vmatprep.mubr.f32.mxu1 %v7841_v3  ;;  %6325 = vmatpush3.bf16.msra.mxu1 %v6322_v15  ;;  %v3480_v3 = vld [vmem:[#allocation2 + $0x132] sm:$0xff] }
 0x368   :  { %6327 = vmatprep.subr.bf16.mxu1 %v6326_v34 }
 0x36a   :  { %5697 = vmatmul.mubr.f32.gmra.mrb[12].mxu1 %v3284_v22 }
 0x36b   :  { %5699 = vmatprep.mubr.f32.mxu1 %v7867_v39  ;;  %6329 = vmatpush3.bf16.msra.mxu1 %v6326_v34 }
 0x36c   :  { %6331 = vmatprep.subr.bf16.mxu1 %v6330_v30 }
 0x36e   :  { %5700 = vmatmul.mubr.f32.gmra.mrb[14].mxu1 %v3286_v23 }
 0x36f   :  { %6333 = vmatpush3.bf16.msra.mxu1 %v6330_v30  ;;  %5734 = vmatprep.mubr.f32.mxu1 %v8011_v48 }
 0x372   :  { %5735 = vmatmul.mubr.f32.vlgmr.msra.gmra.mrb[0].mxu1 %v8014_v13 }
 0x373   :  { %5737 = vmatprep.mubr.f32.mxu1 %v8023_v62 }
 0x376   :  { %5738 = vmatmul.mubr.f32.gmra.mrb[2].mxu1 %v8026_v33 }
 0x377   :  { %5740 = vmatprep.mubr.f32.mxu1 %v8035_v5 }
 0x37a   :  { %5741 = vmatmul.mubr.f32.gmra.mrb[4].mxu1 %v8038_v60 }
 0x37b   :  { %5743 = vmatprep.mubr.f32.mxu1 %v8249_v0 }
 0x37e   :  { %5744 = vmatmul.mubr.f32.gmra.mrb[6].mxu1 %v3472_v37 }
 0x37f   :  { %5746 = vmatprep.mubr.f32.mxu1 %v8056_v47 }
 0x382   :  { %5747 = vmatmul.mubr.f32.gmra.mrb[8].mxu1 %v8059_v6 }
 0x383   :  { %5749 = vmatprep.mubr.f32.mxu1 %v8068_v16 }
 0x386   :  { %5750 = vmatmul.mubr.f32.gmra.mrb[10].mxu1 %v8071_v59 }
 0x387   :  { %5752 = vmatprep.mubr.f32.mxu1 %v8080_v4 }
 0x38a   :  { %5753 = vmatmul.mubr.f32.gmra.mrb[12].mxu1 %v8083_v10 }
 0x38b   :  { %5755 = vmatprep.mubr.f32.mxu1 %v8283_v49 }
 0x38e   :  { %5756 = vmatmul.mubr.f32.gmra.mrb[14].mxu1 %v3480_v3 }
 0x445   :  { %v8409_v39 = vpop.f32.mrb[0].mxu1 }
 0x446   :  { %v8411_v48 = vpop.f32.mrb[1].mxu1 }
 0x447   :  { %v3661_v13 = vadd.f32 %v8409_v39, %v8411_v48 }
 0x449   :  { %v8415_v62 = vpop.f32.mrb[2].mxu1 }
 0x44a   :  { %v8417_v33 = vpop.f32.mrb[3].mxu1 }
 0x44b   :  { %v3662_v5 = vadd.f32 %v3661_v13, %v8417_v33 }
 0x44d   :  { %v8420_v60 = vpop.f32.mrb[4].mxu1  ;;  %v3663_v47 = vadd.f32 %v8415_v62, %v3662_v5 }
 0x44e   :  { %v8423_v6 = vpop.f32.mrb[5].mxu1 }
 0x44f   :  { %v3664_v16 = vadd.f32 %v3663_v47, %v8423_v6 }
 0x451   :  { %v8426_v59 = vpop.f32.mrb[6].mxu1  ;;  %v3665_v4 = vadd.f32 %v8420_v60, %v3664_v16 }
 0x452   :  { %v8429_v10 = vpop.f32.mrb[7].mxu1 }
 0x453   :  { %v3666_v0 = vadd.f32 %v3665_v4, %v8429_v10 }
 0x455   :  { %v8432_v49 = vpop.f32.mrb[8].mxu1  ;;  %v3667_v18 = vadd.f32 %v8426_v59, %v3666_v0 }
 0x456   :  { %v8435_v41 = vpop.f32.mrb[9].mxu1 }
 0x457   :  { %v3668_v53 = vadd.f32 %v3667_v18, %v8435_v41 }
 0x459   :  { %v8438_v19 = vpop.f32.mrb[10].mxu1  ;;  %v3669_v61 = vadd.f32 %v8432_v49, %v3668_v53 }
 0x45a   :  { %v8441_v7 = vpop.f32.mrb[11].mxu1 }
 0x45b   :  { %v3670_v26 = vadd.f32 %v3669_v61, %v8441_v7 }
 0x45d   :  { %v8444_v43 = vpop.f32.mrb[12].mxu1  ;;  %v3671_v32 = vadd.f32 %v8438_v19, %v3670_v26 }
 0x45e   :  { %v8447_v42 = vpop.f32.mrb[13].mxu1 }
 0x45f   :  { %v3672_v46 = vadd.f32 %v3671_v32, %v8447_v42 }
 0x461   :  { %v8450_v38 = vpop.f32.mrb[14].mxu1  ;;  %v3673_v14 = vadd.f32 %v8444_v43, %v3672_v46 }
 0x462   :  { %v8453_v45 = vpop.f32.mrb[15].mxu1 }
 0x463   :  { %v3674_v12 = vadd.f32 %v3673_v14, %v8453_v45 }
 0x465   :  { %v3675_v21 = vadd.f32 %v8450_v38, %v3674_v12 }
 0x467   :  { %v3676_v31 = vrot.slane %v3675_v21, 4 }
 0x469   :  { %v3677_v1 = vadd.f32 %v3676_v31, %v3675_v21 }
 0x46b   :  { %v3678_v52 = vrot.slane %v3677_v1, 2 }
 0x46d   :  { %v3679_v36 = vadd.f32 %v3678_v52, %v3677_v1 }
 0x46f   :  { %v3680_v58 = vrot.slane %v3679_v36, 1 }
 0x471   :  { %v3681_v20 = vadd.f32 %v3680_v58, %v3679_v36 }
 0x473   :  { %v8457_v24 = vmul.f32 0.0078125, %v3681_v20 }
 0x475   :  { %v3683_v40 = vsub.f32 %v8411_v48, %v8457_v24  ;;  %v3684_v50 = vsub.f32 %v8409_v39, %v8457_v24  ;;  %v3685_v29 = vsub.f32 %v8417_v33, %v8457_v24  ;;  %v3686_v25 = vsub.f32 %v8415_v62, %v8457_v24 }
 0x476   :  { %v3687_v8 = vsub.f32 %v8423_v6, %v8457_v24  ;;  %v3688_v51 = vsub.f32 %v8420_v60, %v8457_v24  ;;  %v3689_v11 = vsub.f32 %v8429_v10, %v8457_v24  ;;  %v3690_v55 = vsub.f32 %v8426_v59, %v8457_v24 }
 0x477   :  { %v3691_v56 = vsub.f32 %v8435_v41, %v8457_v24  ;;  %v3692_v44 = vsub.f32 %v8432_v49, %v8457_v24  ;;  %v3693_v9 = vsub.f32 %v8441_v7, %v8457_v24  ;;  %v3694_v27 = vsub.f32 %v8438_v19, %v8457_v24 }
 0x478   :  { %v3695_v17 = vsub.f32 %v8447_v42, %v8457_v24  ;;  %v3696_v15 = vsub.f32 %v8444_v43, %v8457_v24  ;;  %v3697_v63 = vsub.f32 %v8453_v45, %v8457_v24  ;;  %v3698_v54 = vsub.f32 %v8450_v38, %v8457_v24 }
 0x479   :  { %v3699_v2 = vmul.f32 %v3683_v40, %v3683_v40  ;;  %v3700_v34 = vmul.f32 %v3684_v50, %v3684_v50  ;;  %v3701_v57 = vmul.f32 %v3685_v29, %v3685_v29  ;;  %v3702_v30 = vmul.f32 %v3686_v25, %v3686_v25 }
 0x47a   :  { %v3703_v23 = vmul.f32 %v3687_v8, %v3687_v8  ;;  %v3704_v3 = vmul.f32 %v3688_v51, %v3688_v51  ;;  %v3705_v5 = vmul.f32 %v3689_v11, %v3689_v11  ;;  %v3706_v16 = vmul.f32 %v3690_v55, %v3690_v55 }
 0x47b   :  { %v3715_v35 = vadd.f32 %v3700_v34, %v3699_v2  ;;  %v3707_v0 = vmul.f32 %v3691_v56, %v3691_v56  ;;  %v3708_v53 = vmul.f32 %v3692_v44, %v3692_v44  ;;  %v3709_v26 = vmul.f32 %v3693_v9, %v3693_v9  ;;  %v3659_v44 = vld [vmem:[%s8569_s5] sm:$0x1] }
 0x47c   :  { %v3710_v46 = vmul.f32 %v3694_v27, %v3694_v27  ;;  %v3711_v12 = vmul.f32 %v3695_v17, %v3695_v17  ;;  %v3712_v31 = vmul.f32 %v3696_v15, %v3696_v15  ;;  %v3713_v52 = vmul.f32 %v3697_v63, %v3697_v63  ;;  %v3660_v17 = vld [vmem:[%s8570_s6] sm:$0x1] }
 0x47d   :  { %v3716_v22 = vadd.f32 %v3715_v35, %v3701_v57  ;;  %v3714_v58 = vmul.f32 %v3698_v54, %v3698_v54 }
 0x47f   :  { %v3717_v37 = vadd.f32 %v3716_v22, %v3702_v30 }
 0x481   :  { %v3718_v13 = vadd.f32 %v3717_v37, %v3703_v23 }
 0x483   :  { %v3719_v47 = vadd.f32 %v3718_v13, %v3704_v3 }
 0x485   :  { %v3720_v4 = vadd.f32 %v3719_v47, %v3705_v5 }
 0x487   :  { %v3721_v18 = vadd.f32 %v3720_v4, %v3706_v16 }
 0x489   :  { %v3722_v61 = vadd.f32 %v3721_v18, %v3707_v0 }
 0x48b   :  { %v3723_v32 = vadd.f32 %v3722_v61, %v3708_v53 }
 0x48d   :  { %v3724_v14 = vadd.f32 %v3723_v32, %v3709_v26 }
 0x48f   :  { %v3725_v21 = vadd.f32 %v3724_v14, %v3710_v46 }
 0x491   :  { %v3726_v1 = vadd.f32 %v3725_v21, %v3711_v12 }
 0x493   :  { %v3727_v36 = vadd.f32 %v3726_v1, %v3712_v31 }
 0x495   :  { %v3728_v20 = vadd.f32 %v3727_v36, %v3713_v52 }
 0x497   :  { %v3729_v40 = vadd.f32 %v3728_v20, %v3714_v58 }
 0x499   :  { %v3730_v50 = vrot.slane %v3729_v40, 4 }
 0x49b   :  { %v3731_v29 = vadd.f32 %v3730_v50, %v3729_v40 }
 0x49d   :  { %v3732_v25 = vrot.slane %v3731_v29, 2 }
 0x49f   :  { %v3733_v8 = vadd.f32 %v3732_v25, %v3731_v29 }
 0x4a1   :  { %v3734_v51 = vrot.slane %v3733_v8, 1 }
 0x4a3   :  { %v3735_v11 = vadd.f32 %v3734_v51, %v3733_v8 }
 0x4a5   :  { %v3736_v55 = vmul.f32 0.0078125, %v3735_v11 }
 0x4a7   :  { %v3737_v56 = vadd.f32 1e-05, %v3736_v55 }
 0x4a9   :  { %6593 = vrsqrt.f32 %v3737_v56 }
 0x4b3   :  { %v6594_v9 = vpop.eup %6593 }
 0x4b4   :  { %v3739_v27 = vmul.f32 %v6594_v9, %v3659_v44 }
 0x4b6   :  { %v3740_v15 = vmul.f32 %v3739_v27, %v8457_v24  ;;  %v3746_v63 = vrot.slane %v3739_v27, %v7725_v28 }
 0x4b8   :  { %v3741_v54 = vsub.f32 %v3660_v17, %v3740_v15  ;;  %v3748_v2 = vmul.f32 %v3746_v63, %v8411_v48  ;;  %v3749_v34 = vmul.f32 %v8409_v39, %v3746_v63  ;;  %v3750_v57 = vmul.f32 %v3746_v63, %v8417_v33 }
 0x4b9   :  { %v3751_v35 = vmul.f32 %v8415_v62, %v3746_v63  ;;  %v3752_v30 = vmul.f32 %v3746_v63, %v8423_v6  ;;  %v3753_v22 = vmul.f32 %v8420_v60, %v3746_v63  ;;  %v3754_v23 = vmul.f32 %v3746_v63, %v8429_v10 }
 0x4ba   :  { %v3755_v37 = vmul.f32 %v8426_v59, %v3746_v63  ;;  %v3756_v24 = vmul.f32 %v3746_v63, %v8435_v41  ;;  %v3757_v3 = vmul.f32 %v8432_v49, %v3746_v63  ;;  %v3758_v48 = vmul.f32 %v3746_v63, %v8441_v7 }
 0x4bb   :  { %v3759_v39 = vmul.f32 %v8438_v19, %v3746_v63  ;;  %v3760_v33 = vmul.f32 %v3746_v63, %v8447_v42  ;;  %v3761_v62 = vmul.f32 %v8444_v43, %v3746_v63  ;;  %v3762_v6 = vmul.f32 %v3746_v63, %v8453_v45 }
 0x4bc   :  { %v3763_v60 = vmul.f32 %v8450_v38, %v3746_v63  ;;  %v3768_v10 = vrot.slane %v3741_v54, %v7725_v28 }
 0x4be   :  { %v3770_v13 = vadd.f32 %v3768_v10, %v3748_v2  ;;  %v3771_v59 = vadd.f32 %v3768_v10, %v3749_v34  ;;  %v3772_v5 = vadd.f32 %v3768_v10, %v3750_v57  ;;  %v3773_v41 = vadd.f32 %v3768_v10, %v3751_v35 }
 0x4bf   :  { %v3774_v47 = vadd.f32 %v3768_v10, %v3752_v30  ;;  %v3775_v49 = vadd.f32 %v3768_v10, %v3753_v22  ;;  %v3776_v16 = vadd.f32 %v3768_v10, %v3754_v23  ;;  %v3777_v7 = vadd.f32 %v3768_v10, %v3755_v37 }
 0x4c0   :  { %v3778_v4 = vadd.f32 %v3768_v10, %v3756_v24  ;;  %v3779_v19 = vadd.f32 %v3768_v10, %v3757_v3  ;;  %v3780_v0 = vadd.f32 %v3768_v10, %v3758_v48  ;;  %v3781_v42 = vadd.f32 %v3768_v10, %v3759_v39  ;;  %3786 = vst [vmem:[%s8571_s7] sm:$0xff] %v3770_v13 }
 0x4c1   :  { %3787 = vst [vmem:[%s8571_s7 + $0x8] sm:$0xff] %v3771_v59  ;;  %3788 = vst [vmem:[%s8571_s7 + $0x10] sm:$0xff] %v3772_v5  ;;  %v3782_v28 = vadd.f32 %v3768_v10, %v3760_v33  ;;  %v3783_v43 = vadd.f32 %v3768_v10, %v3761_v62  ;;  %v3784_v38 = vadd.f32 %v3768_v10, %v3762_v6 }
 0x4c2   :  { %3789 = vst [vmem:[%s8571_s7 + $0x18] sm:$0xff] %v3773_v41  ;;  %v3785_v45 = vadd.f32 %v3768_v10, %v3763_v60  ;;  %3790 = vst [vmem:[%s8571_s7 + $0x20] sm:$0xff] %v3774_v47 }
 0x4c3   :  { %3791 = vst [vmem:[%s8571_s7 + $0x28] sm:$0xff] %v3775_v49  ;;  %3792 = vst [vmem:[%s8571_s7 + $0x30] sm:$0xff] %v3776_v16 }
 0x4c4   :  { %3793 = vst [vmem:[%s8571_s7 + $0x38] sm:$0xff] %v3777_v7  ;;  %3794 = vst [vmem:[%s8571_s7 + $0x40] sm:$0xff] %v3778_v4 }
 0x4c5   :  { %3795 = vst [vmem:[%s8571_s7 + $0x48] sm:$0xff] %v3779_v19  ;;  %3796 = vst [vmem:[%s8571_s7 + $0x50] sm:$0xff] %v3780_v0 }
 0x4c6   :  { %3797 = vst [vmem:[%s8571_s7 + $0x58] sm:$0xff] %v3781_v42  ;;  %3798 = vst [vmem:[%s8571_s7 + $0x60] sm:$0xff] %v3782_v28 }
 0x4c7   :  { %3799 = vst [vmem:[%s8571_s7 + $0x68] sm:$0xff] %v3783_v43  ;;  %3800 = vst [vmem:[%s8571_s7 + $0x70] sm:$0xff] %v3784_v38 }
 0x4c8   :  { %3801 = vst [vmem:[%s8571_s7 + $0x78] sm:$0xff] %v3785_v45 }

</bundles_post_ra>
